<compile_context>
chip_gen: v6e
topology: v6e:2x2x1
jax: 0.10.0
libtpu: 0.0.40
codegen_flags: <defaults>
</compile_context>

<pallas_src>
import jax
import jax.numpy as jnp
from jax.experimental import pallas as pl
from jax.experimental.pallas import tpu as pltpu

IN_DIM = 28 * 28   # 784
HID = 512
OUT_DIM = 10
OUT_PAD = 128      # lane-dense padded output width
TM_MAX = 1024      # max batch tile (still leaves >20 MiB scoped-VMEM headroom)


def mlp_kernel(x_ref, w1_ref, b1_ref, w2_ref, b2_ref, w3_ref, b3_ref, out_ref):
    # x_ref: (TM, 784) bf16; w*: bf16; b*: f32; out_ref: (TM, 128) f32
    x = x_ref[...].astype(jnp.bfloat16)          # no-op: x arrives as bf16
    h1 = jnp.dot(x, w1_ref[...], preferred_element_type=jnp.float32)
    h1 = jnp.maximum(h1 + b1_ref[...], 0.0).astype(jnp.bfloat16)
    h2 = jnp.dot(h1, w2_ref[...], preferred_element_type=jnp.float32)
    h2 = jnp.maximum(h2 + b2_ref[...], 0.0).astype(jnp.bfloat16)
    logits = jnp.dot(h2, w3_ref[...], preferred_element_type=jnp.float32)
    out_ref[...] = (logits + b3_ref[...]).astype(out_ref.dtype)   # bias add in f32


def _round_up(n, m):
    return ((n + m - 1) // m) * m


def _choose_tm(batch):
    """Pick the batch tile size (static, from the traced shape).

    * 128-aligned (MXU M granularity) once the batch supports it, capped at
      TM_MAX.
    * Minimizes padded rows for ragged batches.
    * Prefers >=2 grid steps so the "parallel" axis can use both v7x
      TensorCores; ties broken toward the largest tile (less per-step overhead).
    """
    if batch <= 128:
        return _round_up(max(batch, 8), 8)       # single small tile; latency-bound
    best_key, best_tm = None, 128
    for tm in range(128, TM_MAX + 1, 128):
        n_steps = -(-batch // tm)                # ceil
        pad = n_steps * tm - batch
        key = (0 if n_steps >= 2 else 1, pad, -tm)
        if best_key is None or key < best_key:
            best_key, best_tm = key, tm
    return best_tm


@jax.jit
def neural_network_forward(x, params):
    """x: (B, 28, 28) or (B, 784). Returns logits (B, 10) in float32."""
    B = x.shape[0]
    w1, b1, w2, b2, w3p, b3p = params            # w3p/b3p already lane-padded to 128

    TM = _choose_tm(B)
    B_pad = _round_up(B, TM)

    # Flatten + bf16 cast + batch pad: fuse into one producer under jit.
    x2d = x.reshape(B, IN_DIM).astype(jnp.bfloat16)
    if B_pad != B:
        x2d = jnp.pad(x2d, ((0, B_pad - B), (0, 0)))

    grid = (B_pad // TM,)

    # Weights/biases: constant index_map -> fetched once, VMEM-resident across steps.
    const = lambda shape: pl.BlockSpec(shape, lambda i: tuple(0 for _ in shape))

    out = pl.pallas_call(
        mlp_kernel,
        out_shape=jax.ShapeDtypeStruct((B_pad, OUT_PAD), jnp.float32),
        grid=grid,
        in_specs=[
            pl.BlockSpec((TM, IN_DIM), lambda i: (i, 0)),   # x tile (pipelined)
            const((IN_DIM, HID)), const((1, HID)),          # w1, b1
            const((HID, HID)),   const((1, HID)),           # w2, b2
            const((HID, OUT_PAD)), const((1, OUT_PAD)),     # w3 (padded), b3 (padded)
        ],
        out_specs=pl.BlockSpec((TM, OUT_PAD), lambda i: (i, 0)),
        compiler_params=pltpu.CompilerParams(
            dimension_semantics=("parallel",),
        ),
    )(x2d, w1, b1, w2, b2, w3p, b3p)

    return out[:B, :OUT_DIM]


def init_params(key):
    """PyTorch-style uniform init. Weights bf16 (in, out); biases f32.
    The last layer is zero-padded 10 -> 128 lanes here (once), not per call."""
    k1, k2, k3 = jax.random.split(key, 3)

    def linear(k, fan_in, fan_out, pad_out=None):
        bound = 1.0 / jnp.sqrt(fan_in)
        kw, kb = jax.random.split(k)
        w = jax.random.uniform(kw, (fan_in, fan_out), jnp.float32, -bound, bound)
        b = jax.random.uniform(kb, (1, fan_out), jnp.float32, -bound, bound)
        if pad_out is not None:
            w = jnp.zeros((fan_in, pad_out), jnp.float32).at[:, :fan_out].set(w)
            b = jnp.zeros((1, pad_out), jnp.float32).at[:, :fan_out].set(b)
        return w.astype(jnp.bfloat16), b

    w1, b1 = linear(k1, IN_DIM, HID)
    w2, b2 = linear(k2, HID, HID)
    w3p, b3p = linear(k3, HID, OUT_DIM, pad_out=OUT_PAD)
    return (w1, b1, w2, b2, w3p, b3p)


def ref_forward(x, params):
    """Plain-JAX reference with the same mixed precision as the kernel."""
    w1, b1, w2, b2, w3p, b3p = params
    h = x.reshape(x.shape[0], IN_DIM).astype(jnp.bfloat16)
    h = jnp.maximum(jnp.dot(h, w1, preferred_element_type=jnp.float32) + b1, 0.0)
    h = jnp.maximum(jnp.dot(h.astype(jnp.bfloat16), w2,
                            preferred_element_type=jnp.float32) + b2, 0.0)
    out = jnp.dot(h.astype(jnp.bfloat16), w3p,
                  preferred_element_type=jnp.float32) + b3p
    return out[:, :OUT_DIM]


if __name__ == "__main__":
    key = jax.random.PRNGKey(0)
    kx, kp, kx2 = jax.random.split(key, 3)
    params = init_params(kp)

    # Small batch (single small tile path).
    B = 8
    x = jax.random.normal(kx, (B, 28, 28), dtype=jnp.float32)
    logits = neural_network_forward(x, params)
    jax.block_until_ready(logits)
    assert logits.shape == (B, OUT_DIM)
    ref = ref_forward(x, params)
    assert jnp.allclose(logits, ref, atol=2e-2, rtol=2e-2)

    # Ragged batch: exercises the waste-minimizing multi-tile path (3 x 128).
    B2 = 300
    x2 = jax.random.normal(kx2, (B2, 28, 28), dtype=jnp.float32)
    logits2 = neural_network_forward(x2, params)
    jax.block_until_ready(logits2)
    assert logits2.shape == (B2, OUT_DIM)
    ref2 = ref_forward(x2, params)
    assert jnp.allclose(logits2, ref2, atol=2e-2, rtol=2e-2)

    print("KERNEL_OK")
</pallas_src>

<mosaic_0001>
module attributes {stable_mosaic.version = 11 : i64} {
  func.func @mlp_kernel(%arg0: i32, %arg1: memref<8x784xbf16, #tpu.memory_space<vmem>>, %arg2: memref<784x512xbf16, #tpu.memory_space<vmem>>, %arg3: memref<1x512xf32, #tpu.memory_space<vmem>>, %arg4: memref<512x512xbf16, #tpu.memory_space<vmem>>, %arg5: memref<1x512xf32, #tpu.memory_space<vmem>>, %arg6: memref<512x128xbf16, #tpu.memory_space<vmem>>, %arg7: memref<1x128xf32, #tpu.memory_space<vmem>>, %arg8: memref<8x128xf32, #tpu.memory_space<vmem>>) attributes {dimension_semantics = [#tpu.dimension_semantics<parallel>], iteration_bounds = array<i64: 1>, scalar_prefetch = 0 : i64, scratch_operands = 0 : i64, tpu.core_type = #tpu.core_type<tc>, window_params = [{transform_indices = @transform_0, window_bounds = array<i64: 8, 784>}, {pipeline_mode = #tpu.pipeline_mode<synchronous>, transform_indices = @transform_1, window_bounds = array<i64: 784, 512>}, {pipeline_mode = #tpu.pipeline_mode<synchronous>, transform_indices = @transform_2, window_bounds = array<i64: 1, 512>}, {pipeline_mode = #tpu.pipeline_mode<synchronous>, transform_indices = @transform_3, window_bounds = array<i64: 512, 512>}, {pipeline_mode = #tpu.pipeline_mode<synchronous>, transform_indices = @transform_4, window_bounds = array<i64: 1, 512>}, {pipeline_mode = #tpu.pipeline_mode<synchronous>, transform_indices = @transform_5, window_bounds = array<i64: 512, 128>}, {pipeline_mode = #tpu.pipeline_mode<synchronous>, transform_indices = @transform_6, window_bounds = array<i64: 1, 128>}, {transform_indices = @transform_7, window_bounds = array<i64: 8, 128>}]} {
    %c0 = arith.constant 0 : index
    %c0_0 = arith.constant 0 : index
    %0 = vector.load %arg1[%c0, %c0_0] : memref<8x784xbf16, #tpu.memory_space<vmem>>, vector<8x784xbf16>
    %c0_1 = arith.constant 0 : index
    %c0_2 = arith.constant 0 : index
    %1 = vector.load %arg2[%c0_1, %c0_2] : memref<784x512xbf16, #tpu.memory_space<vmem>>, vector<784x512xbf16>
    %cst = arith.constant dense<0.000000e+00> : vector<8x512xf32>
    %2 = tpu.matmul %0, %1, %cst {dimension_numbers = #tpu.dot_dimension_numbers<[1], [0], [0], [1], [0, 0, 1, 1], [], []>} : vector<8x784xbf16>, vector<784x512xbf16>, vector<8x512xf32> -> vector<8x512xf32>
    %c0_3 = arith.constant 0 : index
    %c0_4 = arith.constant 0 : index
    %3 = vector.load %arg3[%c0_3, %c0_4] : memref<1x512xf32, #tpu.memory_space<vmem>>, vector<1x512xf32>
    %4 = vector.broadcast %3 : vector<1x512xf32> to vector<8x512xf32>
    %5 = arith.addf %2, %4 : vector<8x512xf32>
    %cst_5 = arith.constant 0.000000e+00 : f32
    %6 = vector.broadcast %cst_5 : f32 to vector<8x512xf32>
    %7 = arith.maximumf %5, %6 : vector<8x512xf32>
    %8 = arith.truncf %7 : vector<8x512xf32> to vector<8x512xbf16>
    %c0_6 = arith.constant 0 : index
    %c0_7 = arith.constant 0 : index
    %9 = vector.load %arg4[%c0_6, %c0_7] : memref<512x512xbf16, #tpu.memory_space<vmem>>, vector<512x512xbf16>
    %cst_8 = arith.constant dense<0.000000e+00> : vector<8x512xf32>
    %10 = tpu.matmul %8, %9, %cst_8 {dimension_numbers = #tpu.dot_dimension_numbers<[1], [0], [0], [1], [0, 0, 1, 1], [], []>} : vector<8x512xbf16>, vector<512x512xbf16>, vector<8x512xf32> -> vector<8x512xf32>
    %c0_9 = arith.constant 0 : index
    %c0_10 = arith.constant 0 : index
    %11 = vector.load %arg5[%c0_9, %c0_10] : memref<1x512xf32, #tpu.memory_space<vmem>>, vector<1x512xf32>
    %12 = vector.broadcast %11 : vector<1x512xf32> to vector<8x512xf32>
    %13 = arith.addf %10, %12 : vector<8x512xf32>
    %cst_11 = arith.constant 0.000000e+00 : f32
    %14 = vector.broadcast %cst_11 : f32 to vector<8x512xf32>
    %15 = arith.maximumf %13, %14 : vector<8x512xf32>
    %16 = arith.truncf %15 : vector<8x512xf32> to vector<8x512xbf16>
    %c0_12 = arith.constant 0 : index
    %c0_13 = arith.constant 0 : index
    %17 = vector.load %arg6[%c0_12, %c0_13] : memref<512x128xbf16, #tpu.memory_space<vmem>>, vector<512x128xbf16>
    %cst_14 = arith.constant dense<0.000000e+00> : vector<8x128xf32>
    %18 = tpu.matmul %16, %17, %cst_14 {dimension_numbers = #tpu.dot_dimension_numbers<[1], [0], [0], [1], [0, 0, 1, 1], [], []>} : vector<8x512xbf16>, vector<512x128xbf16>, vector<8x128xf32> -> vector<8x128xf32>
    %c0_15 = arith.constant 0 : index
    %c0_16 = arith.constant 0 : index
    %19 = vector.load %arg7[%c0_15, %c0_16] : memref<1x128xf32, #tpu.memory_space<vmem>>, vector<1x128xf32>
    %20 = vector.broadcast %19 : vector<1x128xf32> to vector<8x128xf32>
    %21 = arith.addf %18, %20 : vector<8x128xf32>
    %c0_17 = arith.constant 0 : index
    %c0_18 = arith.constant 0 : index
    %22 = vector.load %arg8[%c0_17, %c0_18] : memref<8x128xf32, #tpu.memory_space<vmem>>, vector<8x128xf32>
    tpu.vector_store %arg8[%c0_17, %c0_18], %21 {strides = array<i32>} : memref<8x128xf32, #tpu.memory_space<vmem>>, vector<8x128xf32>,
    return
  }
  func.func @transform_0(%arg0: i32) -> (i32, i32) {
    %c0_i32 = arith.constant 0 : i32
    %c0_i32_0 = arith.constant 0 : i32
    return %arg0, %c0_i32 : i32, i32
  }
  func.func @transform_1(%arg0: i32) -> (i32, i32) {
    %c0_i32 = arith.constant 0 : i32
    %c0_i32_0 = arith.constant 0 : i32
    %c0_i32_1 = arith.constant 0 : i32
    return %c0_i32, %c0_i32_0 : i32, i32
  }
  func.func @transform_2(%arg0: i32) -> (i32, i32) {
    %c0_i32 = arith.constant 0 : i32
    %c0_i32_0 = arith.constant 0 : i32
    %c0_i32_1 = arith.constant 0 : i32
    return %c0_i32, %c0_i32_0 : i32, i32
  }
  func.func @transform_3(%arg0: i32) -> (i32, i32) {
    %c0_i32 = arith.constant 0 : i32
    %c0_i32_0 = arith.constant 0 : i32
    %c0_i32_1 = arith.constant 0 : i32
    return %c0_i32, %c0_i32_0 : i32, i32
  }
  func.func @transform_4(%arg0: i32) -> (i32, i32) {
    %c0_i32 = arith.constant 0 : i32
    %c0_i32_0 = arith.constant 0 : i32
    %c0_i32_1 = arith.constant 0 : i32
    return %c0_i32, %c0_i32_0 : i32, i32
  }
  func.func @transform_5(%arg0: i32) -> (i32, i32) {
    %c0_i32 = arith.constant 0 : i32
    %c0_i32_0 = arith.constant 0 : i32
    %c0_i32_1 = arith.constant 0 : i32
    return %c0_i32, %c0_i32_0 : i32, i32
  }
  func.func @transform_6(%arg0: i32) -> (i32, i32) {
    %c0_i32 = arith.constant 0 : i32
    %c0_i32_0 = arith.constant 0 : i32
    %c0_i32_1 = arith.constant 0 : i32
    return %c0_i32, %c0_i32_0 : i32, i32
  }
  func.func @transform_7(%arg0: i32) -> (i32, i32) {
    %c0_i32 = arith.constant 0 : i32
    %c0_i32_0 = arith.constant 0 : i32
    return %arg0, %c0_i32 : i32, i32
  }
}

</mosaic_0001>

<bundles_post_ra>
// kernel: neural_network_forward.1
= control target key start
LH: loop header
LB: loop body
LE: loop exit
PB: predicated region body
PF: predicated region fallthrough
CT: control target
= control target key end

     0   :  { %12 = vsyncpa [#allocation3], 0  ;;  %s4203_s0 = inlined_call_operand.vmem [shape: bf16[8,784], index: 0, kind: input, shape index: {}]   ;;  %s4204_s1 = inlined_call_operand.hbm [shape: bf16[784,512], index: 1, kind: input, shape index: {}]   ;;  %s4205_s2 = inlined_call_operand.vmem [shape: f32[1,512], index: 2, kind: input, shape index: {}]   ;;  %s4206_s3 = inlined_call_operand.hbm [shape: bf16[512,512], index: 3, kind: input, shape index: {}]   ;;  %s4207_s4 = inlined_call_operand.vmem [shape: f32[1,512], index: 4, kind: input, shape index: {}]   ;;  %s4208_s5 = inlined_call_operand.vmem [shape: bf16[512,128], index: 5, kind: input, shape index: {}]   ;;  %s4209_s6 = inlined_call_operand.vmem [shape: f32[1,128], index: 6, kind: input, shape index: {}]   ;;  %s4210_s7 = inlined_call_operand.hbm [shape: f32[8,128], index: 7, kind: output, shape index: {}]  }
   0x1   :  { %13 = vsyncpa [#allocation6], 0 }
   0x2   :  { %14 = vsyncpa [#allocation4], 0  ;;  %s3952_s24 = smov [#allocation2]  }
   0x3   :  { %s22_s25 = sshll.u32 %s3952_s24, 4  ;;  %s23_s25 = int_to_ptr.vmem [resolvable:$true] %s22_s25 }
   0x4   :  { %s3894_s26 = scalar_lea.vmem %s23_s25, 25088  ;;  %p3899_p1 = scmp.lt.s32.totalorder %s23_s25, %s23_s25 }
   0x5   :  { %p3895_p0 = scmp.ne.s32.totalorder %s23_s25, %s3894_s26  ;;  %p3900_p2 = scmp.lt.s32.totalorder %s3894_s26, %s3894_s26 }
   0x7   :  { %p3901_p3 = por %p3900_p2, %p3899_p1 }
   0x9   :  { %p3902_p4 = pnand %p3901_p3, %p3895_p0 }
   0xb   :  { %3905 = shalt.err (!%p3902_p4)
}
   0xc   :  { %s3953_s27 = smov 256   ;;  %s3954_s28 = smov 16  }
   0xd   :  { %28 = dma.hbm_to_vmem [thread:$0]  %s4204_s1, 25088, %s23_s25, [#allocation3], %s3953_s27, %s3953_s27, %s3954_s28  }
   0xe   :  { %s3955_s8 = smov [#allocation5]  }
   0xf   :  { %s36_s9 = sshll.u32 %s3955_s8, 4  ;;  %s37_s9 = int_to_ptr.vmem [resolvable:$true] %s36_s9 }
  0x10   :  { %s3914_s10 = scalar_lea.vmem %s37_s9, 16384  ;;  %p3919_p6 = scmp.lt.s32.totalorder %s37_s9, %s37_s9 }
  0x11   :  { %p3915_p5 = scmp.ne.s32.totalorder %s37_s9, %s3914_s10  ;;  %p3920_p7 = scmp.lt.s32.totalorder %s3914_s10, %s3914_s10 }
  0x13   :  { %p3921_p8 = por %p3920_p7, %p3919_p6 }
  0x15   :  { %p3922_p9 = pnand %p3921_p8, %p3915_p5 }
  0x17   :  { %3925 = shalt.err (!%p3922_p9)
}
  0x18   :  { %42 = dma.hbm_to_vmem [thread:$0]  %s4206_s3, 16384, %s37_s9, [#allocation6], %s3953_s27, %s3953_s27, %s3954_s28  }
  0x19   :  { %3946 = dma.done.wait [#allocation3], 25088  }
  0x1a   :  { %3947 = vsyncadd [#allocation3], 4294942208 }
  0x1b   :  { %3948 = dma.done.wait [#allocation6], 16384  }
  0x1c   :  { %3949 = vsyncadd [#allocation6], 4294950912  ;;  %v3360_v0 = vld [vmem:[#allocation2 + $0xe4] ss:$16 sps:$4 sm:$0xff]   ;;  %v3364_v2 = vld [vmem:[#allocation2 + $0xe0] ss:$16 sps:$4 sm:$0xff]  }
  0x1d   :  { %v3362_v1 = vld [vmem:[#allocation2 + $0x2e4] ss:$16 sps:$4 sm:$0xff]   ;;  %1286 = vmatprep.subr.bf16.mxu0 %v3360_v0  ;;  %v3365_v3 = vld [vmem:[#allocation2 + $0x2e0] ss:$16 sps:$4 sm:$0xff]   ;;  %v57_v48 = vld [vmem:[%s4203_s0 + $0x8] sm:$0xff]  ;;  %vm1282_vm0 = vcmask 130048  }
  0x1e   :  { %1327 = vmatprep.subr.bf16.mxu1 %v3362_v1  ;;  %v3366_v4 = vld [vmem:[#allocation2 + $0xc4] ss:$16 sps:$4 sm:$0xff]   ;;  %1287 = vmatpush1.bf16.msra.mxu0 %v3364_v2  ;;  %v3370_v6 = vld [vmem:[#allocation2 + $0xc0] ss:$16 sps:$4 sm:$0xff]   ;;  %v4012_v51 = vcombine.high %v57_v48, %v57_v48  ;;  %s3957_s10 = smov [#allocation7]  }
  0x1f   :  { %1328 = vmatpush1.bf16.msra.mxu1 %v3365_v3  ;;  %v3368_v5 = vld [vmem:[#allocation2 + $0x2c4] ss:$16 sps:$4 sm:$0xff]   ;;  %1288 = vmatprep.subr.bf16.mxu0 %v3366_v4  ;;  %v3371_v7 = vld [vmem:[#allocation2 + $0x2c0] ss:$16 sps:$4 sm:$0xff]   ;;  %s2934_s11 = sshll.u32 %s3957_s10, 4  ;;  %s2935_s11 = int_to_ptr.vmem [resolvable:$true] %s2934_s11 }
  0x20   :  { %1329 = vmatprep.subr.bf16.mxu1 %v3368_v5  ;;  %v3372_v8 = vld [vmem:[#allocation2 + $0xa4] ss:$16 sps:$4 sm:$0xff]   ;;  %v3376_v10 = vld [vmem:[#allocation2 + $0xa0] ss:$16 sps:$4 sm:$0xff]   ;;  %1359 = vmatprep.mubr.bf16.mxu1 %v4012_v51  ;;  %s3926_s12 = scalar_lea.vmem %s2935_s11, 128  ;;  %p3931_p11 = scmp.lt.s32.totalorder %s2935_s11, %s2935_s11 }
  0x21   :  { %v3374_v9 = vld [vmem:[#allocation2 + $0x2a4] ss:$16 sps:$4 sm:$0xff]   ;;  %v3377_v11 = vld [vmem:[#allocation2 + $0x2a0] ss:$16 sps:$4 sm:$0xff]   ;;  %p3927_p10 = scmp.ne.s32.totalorder %s2935_s11, %s3926_s12  ;;  %p3932_p12 = scmp.lt.s32.totalorder %s3926_s12, %s3926_s12 }
  0x22   :  { %1289 = vmatpush1.bf16.msra.mxu0 %v3370_v6  ;;  %v3378_v12 = vld [vmem:[#allocation2 + $0x84] ss:$16 sps:$4 sm:$0xff]   ;;  %v3382_v14 = vld [vmem:[#allocation2 + $0x80] ss:$16 sps:$4 sm:$0xff]  }
  0x23   :  { %1330 = vmatpush1.bf16.msra.mxu1 %v3371_v7  ;;  %1290 = vmatprep.subr.bf16.mxu0 %v3372_v8  ;;  %v3380_v13 = vld [vmem:[#allocation2 + $0x284] ss:$16 sps:$4 sm:$0xff]   ;;  %v3383_v15 = vld [vmem:[#allocation2 + $0x280] ss:$16 sps:$4 sm:$0xff]   ;;  %v4018_v7 = vcombine.low %v57_v48, %v57_v48  ;;  %v3520_v48 = vld [vmem:[#allocation2 + $0x1ec] ss:$16 sps:$4 sm:$0xff]   ;;  %p3933_p13 = por %p3932_p12, %p3931_p11 }
  0x24   :  { %1331 = vmatprep.subr.bf16.mxu1 %v3374_v9  ;;  %v3384_v16 = vld [vmem:[#allocation2 + $0x64] ss:$16 sps:$4 sm:$0xff]   ;;  %v3388_v18 = vld [vmem:[#allocation2 + $0x60] ss:$16 sps:$4 sm:$0xff]  }
  0x25   :  { %v3386_v17 = vld [vmem:[#allocation2 + $0x264] ss:$16 sps:$4 sm:$0xff]   ;;  %v3389_v19 = vld [vmem:[#allocation2 + $0x260] ss:$16 sps:$4 sm:$0xff]   ;;  %p3934_p0 = pnand %p3933_p13, %p3927_p10 }
  0x26   :  { %1291 = vmatpush1.bf16.msra.mxu0 %v3376_v10  ;;  %v3390_v20 = vld [vmem:[#allocation2 + $0x44] ss:$16 sps:$4 sm:$0xff]   ;;  %v3394_v22 = vld [vmem:[#allocation2 + $0x40] ss:$16 sps:$4 sm:$0xff]  }
  0x27   :  { %1332 = vmatpush1.bf16.msra.mxu1 %v3377_v11  ;;  %1292 = vmatprep.subr.bf16.mxu0 %v3378_v12  ;;  %v3392_v21 = vld [vmem:[#allocation2 + $0x244] ss:$16 sps:$4 sm:$0xff]   ;;  %v3395_v23 = vld [vmem:[#allocation2 + $0x240] ss:$16 sps:$4 sm:$0xff]   ;;  %v3471_v11 = vld [vmem:[#allocation2 + $0xec] ss:$16 sps:$4 sm:$0xff]  }
  0x28   :  { %1333 = vmatprep.subr.bf16.mxu1 %v3380_v13  ;;  %v3396_v24 = vld [vmem:[#allocation2 + $0x24] ss:$16 sps:$4 sm:$0xff]   ;;  %v3400_v26 = vld [vmem:[#allocation2 + $0x20] ss:$16 sps:$4 sm:$0xff]   ;;  %v3956_v13 = vmov 0  }
  0x29   :  { %v3398_v25 = vld [vmem:[#allocation2 + $0x224] ss:$16 sps:$4 sm:$0xff]   ;;  %v3401_v27 = vld [vmem:[#allocation2 + $0x220] ss:$16 sps:$4 sm:$0xff]  }
  0x2a   :  { %1293 = vmatpush1.bf16.msra.mxu0 %v3382_v14  ;;  %v3402_v28 = vld [vmem:[#allocation2 + $0x4] ss:$16 sps:$4 sm:$0xff]   ;;  %v3406_v30 = vld [vmem:[#allocation2] ss:$16 sps:$4 sm:$0xff]  }
  0x2b   :  { %1334 = vmatpush1.bf16.msra.mxu1 %v3383_v15  ;;  %1294 = vmatprep.subr.bf16.mxu0 %v3384_v16  ;;  %v3404_v29 = vld [vmem:[#allocation2 + $0x204] ss:$16 sps:$4 sm:$0xff]   ;;  %v3407_v31 = vld [vmem:[#allocation2 + $0x200] ss:$16 sps:$4 sm:$0xff]   ;;  %v3469_v15 = vld [vmem:[#allocation2 + $0xe8] ss:$16 sps:$4 sm:$0xff]  }
  0x2c   :  { %1335 = vmatprep.subr.bf16.mxu1 %v3386_v17  ;;  %v3408_v32 = vld [vmem:[#allocation2 + $0x1e4] ss:$16 sps:$4 sm:$0xff]   ;;  %v3412_v34 = vld [vmem:[#allocation2 + $0x1e0] ss:$16 sps:$4 sm:$0xff]   ;;  %v3475_v17 = vld [vmem:[%s4203_s0 + $0x18] ss:$0 sps:$4 sm:$0xff]  }
  0x2d   :  { %v3410_v33 = vld [vmem:[#allocation2 + $0x3e4] ss:$16 sps:$4 sm:$0xff]   ;;  %v3413_v35 = vld [vmem:[#allocation2 + $0x3e0] ss:$16 sps:$4 sm:$0xff]  }
  0x2e   :  { %1295 = vmatpush1.bf16.msra.mxu0 %v3388_v18  ;;  %v3414_v36 = vld [vmem:[#allocation2 + $0x1c4] ss:$16 sps:$4 sm:$0xff]   ;;  %v3418_v38 = vld [vmem:[#allocation2 + $0x1c0] ss:$16 sps:$4 sm:$0xff]   ;;  %v3478_v18 = vld [vmem:[#allocation2 + $0xcc] ss:$16 sps:$4 sm:$0xff]  }
  0x2f   :  { %1336 = vmatpush1.bf16.msra.mxu1 %v3389_v19  ;;  %1296 = vmatprep.subr.bf16.mxu0 %v3390_v20  ;;  %v3416_v37 = vld [vmem:[#allocation2 + $0x3c4] ss:$16 sps:$4 sm:$0xff]   ;;  %v3419_v39 = vld [vmem:[#allocation2 + $0x3c0] ss:$16 sps:$4 sm:$0xff]   ;;  %v3476_v20 = vld [vmem:[#allocation2 + $0xc8] ss:$16 sps:$4 sm:$0xff]  }
  0x30   :  { %1337 = vmatprep.subr.bf16.mxu1 %v3392_v21  ;;  %v3420_v40 = vld [vmem:[#allocation2 + $0x1a4] ss:$16 sps:$4 sm:$0xff]   ;;  %v3424_v42 = vld [vmem:[#allocation2 + $0x1a0] ss:$16 sps:$4 sm:$0xff]  }
  0x31   :  { %v3422_v41 = vld [vmem:[#allocation2 + $0x3a4] ss:$16 sps:$4 sm:$0xff]   ;;  %v3425_v43 = vld [vmem:[#allocation2 + $0x3a0] ss:$16 sps:$4 sm:$0xff]  }
  0x32   :  { %1297 = vmatpush1.bf16.msra.mxu0 %v3394_v22  ;;  %v3426_v44 = vld [vmem:[#allocation2 + $0x184] ss:$16 sps:$4 sm:$0xff]   ;;  %v3430_v49 = vld [vmem:[#allocation2 + $0x180] ss:$16 sps:$4 sm:$0xff]   ;;  %v3484_v22 = vld [vmem:[#allocation2 + $0xac] ss:$16 sps:$4 sm:$0xff]  }
  0x33   :  { %1338 = vmatpush1.bf16.msra.mxu1 %v3395_v23  ;;  %1298 = vmatprep.subr.bf16.mxu0 %v3396_v24  ;;  %v3428_v45 = vld [vmem:[#allocation2 + $0x384] ss:$16 sps:$4 sm:$0xff]   ;;  %v3431_v50 = vld [vmem:[#allocation2 + $0x380] ss:$16 sps:$4 sm:$0xff]   ;;  %v3482_v24 = vld [vmem:[#allocation2 + $0xa8] ss:$16 sps:$4 sm:$0xff]  }
  0x34   :  { %1339 = vmatprep.subr.bf16.mxu1 %v3398_v25  ;;  %v56_v46 = vld [vmem:[%s4203_s0] sm:$0xff] }
  0x35   :  { %v4007_v47 = vcombine.high %v56_v46, %v56_v46  ;;  %v3432_v52 = vld [vmem:[#allocation2 + $0x164] ss:$16 sps:$4 sm:$0xff]   ;;  %v3436_v54 = vld [vmem:[#allocation2 + $0x160] ss:$16 sps:$4 sm:$0xff]   ;;  %v4016_v6 = vcombine.low %v56_v46, %v56_v46  ;;  %v3512_v46 = vld [vmem:[#allocation2 + $0x8] ss:$16 sps:$4 sm:$0xff]  }
  0x36   :  { %1299 = vmatpush1.bf16.msra.mxu0 %v3400_v26  ;;  %v3434_v53 = vld [vmem:[#allocation2 + $0x364] ss:$16 sps:$4 sm:$0xff]   ;;  %v3437_v55 = vld [vmem:[#allocation2 + $0x360] ss:$16 sps:$4 sm:$0xff]   ;;  %v3490_v26 = vld [vmem:[#allocation2 + $0x8c] ss:$16 sps:$4 sm:$0xff]  }
  0x37   :  { %1340 = vmatpush1.bf16.msra.mxu1 %v3401_v27  ;;  %1300 = vmatprep.subr.bf16.mxu0 %v3402_v28  ;;  %v3438_v56 = vld [vmem:[#allocation2 + $0x144] ss:$16 sps:$4 sm:$0xff]   ;;  %v3442_v58 = vld [vmem:[#allocation2 + $0x140] ss:$16 sps:$4 sm:$0xff]   ;;  %v3488_v28 = vld [vmem:[#allocation2 + $0x88] ss:$16 sps:$4 sm:$0xff]  }
  0x38   :  { %1341 = vmatprep.subr.bf16.mxu1 %v3404_v29  ;;  %1318 = vmatprep.mubr.bf16.mxu0 %v4007_v47  ;;  %v3440_v57 = vld [vmem:[#allocation2 + $0x344] ss:$16 sps:$4 sm:$0xff]   ;;  %v3443_v59 = vld [vmem:[#allocation2 + $0x340] ss:$16 sps:$4 sm:$0xff]  }
  0x39   :  { %v3444_v60 = vld [vmem:[#allocation2 + $0x124] ss:$16 sps:$4 sm:$0xff]   ;;  %v3448_v62 = vld [vmem:[#allocation2 + $0x120] ss:$16 sps:$4 sm:$0xff]  }
  0x3a   :  { %1301 = vmatpush1.bf16.msra.mxu0 %v3406_v30  ;;  %v3446_v61 = vld [vmem:[#allocation2 + $0x324] ss:$16 sps:$4 sm:$0xff]   ;;  %v3449_v63 = vld [vmem:[#allocation2 + $0x320] ss:$16 sps:$4 sm:$0xff]   ;;  %v3496_v30 = vld [vmem:[#allocation2 + $0x6c] ss:$16 sps:$4 sm:$0xff]  }
  0x3b   :  { %1342 = vmatpush1.bf16.msra.mxu1 %v3407_v31  ;;  %1302 = vmatprep.subr.bf16.mxu0 %v3408_v32  ;;  %v3450_v0 = vld [vmem:[#allocation2 + $0x104] ss:$16 sps:$4 sm:$0xff]   ;;  %v3454_v2 = vld [vmem:[#allocation2 + $0x100] ss:$16 sps:$4 sm:$0xff]  }
  0x3c   :  { %1343 = vmatprep.subr.bf16.mxu1 %v3410_v33  ;;  %v3452_v1 = vld [vmem:[#allocation2 + $0x304] ss:$16 sps:$4 sm:$0xff]   ;;  %v3455_v3 = vld [vmem:[#allocation2 + $0x300] ss:$16 sps:$4 sm:$0xff]  }
  0x3d   :  { %v3462_v4 = vld [vmem:[#allocation2 + $0x4e4] ss:$16 sps:$4 sm:$0xff]   ;;  %v3460_v8 = vld [vmem:[#allocation2 + $0x4e0] ss:$16 sps:$4 sm:$0xff]  }
  0x3e   :  { %1303 = vmatpush2.bf16.msra.mxu0 %v3412_v34  ;;  %v3465_v5 = vld [vmem:[#allocation2 + $0x604] ss:$16 sps:$4 sm:$0xff]   ;;  %v3463_v9 = vld [vmem:[#allocation2 + $0x600] ss:$16 sps:$4 sm:$0xff]   ;;  %v3494_v34 = vld [vmem:[#allocation2 + $0x68] ss:$16 sps:$4 sm:$0xff]  }
  0x3f   :  { %1344 = vmatpush2.bf16.msra.mxu1 %v3413_v35  ;;  %1304 = vmatprep.subr.bf16.mxu0 %v3414_v36  ;;  %v3468_v10 = vld [vmem:[#allocation2 + $0x4c4] ss:$16 sps:$4 sm:$0xff]   ;;  %v3466_v12 = vld [vmem:[#allocation2 + $0x4c0] ss:$16 sps:$4 sm:$0xff]   ;;  %v3502_v36 = vld [vmem:[#allocation2 + $0x4c] ss:$16 sps:$4 sm:$0xff]  }
  0x40   :  { %1345 = vmatprep.subr.bf16.mxu1 %v3416_v37  ;;  %v3474_v14 = vld [vmem:[#allocation2 + $0x4a4] ss:$16 sps:$4 sm:$0xff]   ;;  %v3472_v16 = vld [vmem:[#allocation2 + $0x4a0] ss:$16 sps:$4 sm:$0xff]  }
  0x41   :  { %v3481_v19 = vld [vmem:[#allocation2 + $0x484] ss:$16 sps:$4 sm:$0xff]   ;;  %v3479_v21 = vld [vmem:[#allocation2 + $0x480] ss:$16 sps:$4 sm:$0xff]  }
  0x42   :  { %1305 = vmatpush2.bf16.msra.mxu0 %v3418_v38  ;;  %v3487_v23 = vld [vmem:[#allocation2 + $0x464] ss:$16 sps:$4 sm:$0xff]   ;;  %v3485_v25 = vld [vmem:[#allocation2 + $0x460] ss:$16 sps:$4 sm:$0xff]   ;;  %v3500_v38 = vld [vmem:[#allocation2 + $0x48] ss:$16 sps:$4 sm:$0xff]  }
  0x43   :  { %1346 = vmatpush2.bf16.msra.mxu1 %v3419_v39  ;;  %1306 = vmatprep.subr.bf16.mxu0 %v3420_v40  ;;  %v3493_v27 = vld [vmem:[#allocation2 + $0x444] ss:$16 sps:$4 sm:$0xff]   ;;  %v3491_v29 = vld [vmem:[#allocation2 + $0x440] ss:$16 sps:$4 sm:$0xff]   ;;  %v3508_v40 = vld [vmem:[#allocation2 + $0x2c] ss:$16 sps:$4 sm:$0xff]  }
  0x44   :  { %1347 = vmatprep.subr.bf16.mxu1 %v3422_v41  ;;  %v3499_v31 = vld [vmem:[#allocation2 + $0x424] ss:$16 sps:$4 sm:$0xff]   ;;  %v3497_v35 = vld [vmem:[#allocation2 + $0x420] ss:$16 sps:$4 sm:$0xff]  }
  0x45   :  { %v4031_v32 = vld [vmem:[%s4203_s0 + $0x10] sm:$0xff] }
  0x46   :  { %1307 = vmatpush2.bf16.msra.mxu0 %v3424_v42  ;;  %v4035_v33 = vcombine.high %v4031_v32, %v4031_v32  ;;  %v3505_v37 = vld [vmem:[#allocation2 + $0x404] ss:$16 sps:$4 sm:$0xff]   ;;  %v3503_v39 = vld [vmem:[#allocation2 + $0x400] ss:$16 sps:$4 sm:$0xff]   ;;  %v3506_v42 = vld [vmem:[#allocation2 + $0x28] ss:$16 sps:$4 sm:$0xff]  }
  0x47   :  { %1348 = vmatpush2.bf16.msra.mxu1 %v3425_v43  ;;  %1308 = vmatprep.subr.bf16.mxu0 %v3426_v44  ;;  %v3511_v41 = vld [vmem:[#allocation2 + $0x5e4] ss:$16 sps:$4 sm:$0xff]   ;;  %v3509_v43 = vld [vmem:[#allocation2 + $0x5e0] ss:$16 sps:$4 sm:$0xff]   ;;  %v3514_v44 = vld [vmem:[#allocation2 + $0xc] ss:$16 sps:$4 sm:$0xff]  }
  0x48   :  { %1349 = vmatprep.subr.bf16.mxu1 %v3428_v45  ;;  %v3517_v45 = vld [vmem:[#allocation2 + $0x5c4] ss:$16 sps:$4 sm:$0xff]  }
  0x4a   :  { %1309 = vmatpush2.bf16.msra.mxu0 %v3430_v49  ;;  %v3523_v49 = vld [vmem:[#allocation2 + $0x5a4] ss:$16 sps:$4 sm:$0xff]  }
  0x4b   :  { %1350 = vmatpush2.bf16.msra.mxu1 %v3431_v50  ;;  %1310 = vmatprep.subr.bf16.mxu0 %v3432_v52  ;;  %v3518_v50 = vld [vmem:[#allocation2 + $0x1e8] ss:$16 sps:$4 sm:$0xff]   ;;  %v3521_v52 = vld [vmem:[#allocation2 + $0x5a0] ss:$16 sps:$4 sm:$0xff]  }
  0x4c   :  { %1351 = vmatprep.subr.bf16.mxu1 %v3434_v53  ;;  %v3526_v53 = vld [vmem:[#allocation2 + $0x1cc] ss:$16 sps:$4 sm:$0xff]  }
  0x4e   :  { %1311 = vmatpush2.bf16.msra.mxu0 %v3436_v54  ;;  %v3529_v54 = vld [vmem:[#allocation2 + $0x584] ss:$16 sps:$4 sm:$0xff]  }
  0x4f   :  { %1352 = vmatpush2.bf16.msra.mxu1 %v3437_v55  ;;  %1312 = vmatprep.subr.bf16.mxu0 %v3438_v56  ;;  %v3524_v55 = vld [vmem:[#allocation2 + $0x1c8] ss:$16 sps:$4 sm:$0xff]   ;;  %v3527_v56 = vld [vmem:[#allocation2 + $0x580] ss:$16 sps:$4 sm:$0xff]  }
  0x50   :  { %1353 = vmatprep.subr.bf16.mxu1 %v3440_v57  ;;  %v3532_v57 = vld [vmem:[#allocation2 + $0x1ac] ss:$16 sps:$4 sm:$0xff]  }
  0x52   :  { %1313 = vmatpush2.bf16.msra.mxu0 %v3442_v58  ;;  %v3535_v58 = vld [vmem:[#allocation2 + $0x564] ss:$16 sps:$4 sm:$0xff]  }
  0x53   :  { %1354 = vmatpush2.bf16.msra.mxu1 %v3443_v59  ;;  %1314 = vmatprep.subr.bf16.mxu0 %v3444_v60  ;;  %v3530_v59 = vld [vmem:[#allocation2 + $0x1a8] ss:$16 sps:$4 sm:$0xff]   ;;  %v3533_v60 = vld [vmem:[#allocation2 + $0x560] ss:$16 sps:$4 sm:$0xff]  }
  0x54   :  { %1355 = vmatprep.subr.bf16.mxu1 %v3446_v61  ;;  %v3538_v61 = vld [vmem:[#allocation2 + $0x18c] ss:$16 sps:$4 sm:$0xff]  }
  0x56   :  { %1315 = vmatpush2.bf16.msra.mxu0 %v3448_v62  ;;  %v3541_v62 = vld [vmem:[#allocation2 + $0x544] ss:$16 sps:$4 sm:$0xff]  }
  0x57   :  { %1356 = vmatpush2.bf16.msra.mxu1 %v3449_v63  ;;  %1316 = vmatprep.subr.bf16.mxu0 %v3450_v0  ;;  %v3536_v63 = vld [vmem:[#allocation2 + $0x188] ss:$16 sps:$4 sm:$0xff]   ;;  %v3539_v0 = vld [vmem:[#allocation2 + $0x540] ss:$16 sps:$4 sm:$0xff]  }
  0x58   :  { %1357 = vmatprep.subr.bf16.mxu1 %v3452_v1  ;;  %v3544_v1 = vld [vmem:[#allocation2 + $0x16c] ss:$16 sps:$4 sm:$0xff]  }
  0x5a   :  { %1317 = vmatpush2.bf16.msra.mxu0 %v3454_v2  ;;  %v3547_v2 = vld [vmem:[#allocation2 + $0x524] ss:$16 sps:$4 sm:$0xff]  }
  0x5b   :  { %1358 = vmatpush2.bf16.msra.mxu1 %v3455_v3  ;;  %1368 = vmatprep.subr.bf16.mxu0 %v3462_v4  ;;  %v3542_v3 = vld [vmem:[#allocation2 + $0x168] ss:$16 sps:$4 sm:$0xff]   ;;  %v3545_v4 = vld [vmem:[#allocation2 + $0x520] ss:$16 sps:$4 sm:$0xff]  }
  0x5c   :  { %1423 = vmatprep.subr.bf16.mxu1 %v3465_v5  ;;  %v3550_v5 = vld [vmem:[#allocation2 + $0x14c] ss:$16 sps:$4 sm:$0xff]  }
  0x5d   :  { %1319 = vmatmul.mubr.bf16.vlgmr.msra.gmra.mxu0 %v4016_v6 }
  0x5e   :  { %1360 = vmatmul.mubr.bf16.vlgmr.msra.gmra.mxu1 %v4018_v7  ;;  %1369 = vmatpush1.bf16.msra.mxu0 %v3460_v8  ;;  %v3553_v8 = vld [vmem:[#allocation2 + $0x504] ss:$16 sps:$4 sm:$0xff]  }
  0x5f   :  { %1424 = vmatpush1.bf16.msra.mxu1 %v3463_v9  ;;  %1370 = vmatprep.subr.bf16.mxu0 %v3468_v10  ;;  %v3548_v9 = vld [vmem:[#allocation2 + $0x148] ss:$16 sps:$4 sm:$0xff]   ;;  %v3551_v10 = vld [vmem:[#allocation2 + $0x500] ss:$16 sps:$4 sm:$0xff]  }
  0x60   :  { %1441 = vmatprep.mubr.bf16.mxu1 %v3956_v13  ;;  %1450 = vmatprep.subr.bf16.mxu1 %v3471_v11  ;;  %v3558_v11 = vld [vmem:[#allocation2 + $0x12c] ss:$16 sps:$4 sm:$0xff]  }
  0x61   :  { %1400 = vmatprep.mubr.bf16.mxu0 %v4035_v33 }
  0x62   :  { %1371 = vmatpush1.bf16.msra.mxu0 %v3466_v12  ;;  %v3561_v12 = vld [vmem:[#allocation2 + $0x2ec] ss:$16 sps:$4 sm:$0xff]  }
  0x63   :  { %1372 = vmatprep.subr.bf16.mxu0 %v3474_v14  ;;  %v4040_v14 = vcombine.low %v4031_v32, %v4031_v32  ;;  %v3583_v32 = vld [vmem:[#allocation2 + $0x268] ss:$16 sps:$4 sm:$0xff]  }
  0x66   :  { %3147 = vmatmul.mubr.msk.bf16.vlgmr.msra.gmra.mxu1 %vm1282_vm0, %v3475_v17  ;;  %1373 = vmatpush1.bf16.msra.mxu0 %v3472_v16  ;;  %v3559_v16 = vld [vmem:[#allocation2 + $0x2e8] ss:$16 sps:$4 sm:$0xff]   ;;  %v3564_v17 = vld [vmem:[#allocation2 + $0x10c] ss:$16 sps:$4 sm:$0xff]  }
  0x67   :  { %1451 = vmatpush1.bf16.msra.mxu1 %v3469_v15  ;;  %1374 = vmatprep.subr.bf16.mxu0 %v3481_v19  ;;  %v3556_v15 = vld [vmem:[#allocation2 + $0x128] ss:$16 sps:$4 sm:$0xff]  }
  0x68   :  { %1452 = vmatprep.subr.bf16.mxu1 %v3478_v18  ;;  %1482 = vmatprep.mubr.bf16.mxu1 %v4007_v47  ;;  %v3515_v47 = vld [vmem:[#allocation2 + $0x5c0] ss:$16 sps:$4 sm:$0xff]   ;;  %v3567_v18 = vld [vmem:[#allocation2 + $0x2cc] ss:$16 sps:$4 sm:$0xff]   ;;  %v3562_v19 = vld [vmem:[#allocation2 + $0x108] ss:$16 sps:$4 sm:$0xff]  }
  0x6a   :  { %1375 = vmatpush1.bf16.msra.mxu0 %v3479_v21  ;;  %v3570_v21 = vld [vmem:[#allocation2 + $0x4ec] ss:$16 sps:$4 sm:$0xff]  }
  0x6b   :  { %1453 = vmatpush1.bf16.msra.mxu1 %v3476_v20  ;;  %1376 = vmatprep.subr.bf16.mxu0 %v3487_v23  ;;  %v3565_v20 = vld [vmem:[#allocation2 + $0x2c8] ss:$16 sps:$4 sm:$0xff]  }
  0x6c   :  { %1454 = vmatprep.subr.bf16.mxu1 %v3484_v22  ;;  %v3573_v22 = vld [vmem:[#allocation2 + $0x2ac] ss:$16 sps:$4 sm:$0xff]   ;;  %v3568_v23 = vld [vmem:[#allocation2 + $0x4e8] ss:$16 sps:$4 sm:$0xff]  }
  0x6e   :  { %1377 = vmatpush1.bf16.msra.mxu0 %v3485_v25  ;;  %v3576_v25 = vld [vmem:[#allocation2 + $0x4cc] ss:$16 sps:$4 sm:$0xff]  }
  0x6f   :  { %1455 = vmatpush1.bf16.msra.mxu1 %v3482_v24  ;;  %1378 = vmatprep.subr.bf16.mxu0 %v3493_v27  ;;  %v3571_v24 = vld [vmem:[#allocation2 + $0x2a8] ss:$16 sps:$4 sm:$0xff]  }
  0x70   :  { %1456 = vmatprep.subr.bf16.mxu1 %v3490_v26  ;;  %v3579_v26 = vld [vmem:[#allocation2 + $0x28c] ss:$16 sps:$4 sm:$0xff]   ;;  %v3574_v27 = vld [vmem:[#allocation2 + $0x4c8] ss:$16 sps:$4 sm:$0xff]  }
  0x72   :  { %1379 = vmatpush1.bf16.msra.mxu0 %v3491_v29  ;;  %v3582_v29 = vld [vmem:[#allocation2 + $0x4ac] ss:$16 sps:$4 sm:$0xff]  }
  0x73   :  { %1457 = vmatpush1.bf16.msra.mxu1 %v3488_v28  ;;  %1380 = vmatprep.subr.bf16.mxu0 %v3499_v31  ;;  %v3577_v28 = vld [vmem:[#allocation2 + $0x288] ss:$16 sps:$4 sm:$0xff]  }
  0x74   :  { %1458 = vmatprep.subr.bf16.mxu1 %v3496_v30  ;;  %v3585_v30 = vld [vmem:[#allocation2 + $0x26c] ss:$16 sps:$4 sm:$0xff]   ;;  %v3580_v31 = vld [vmem:[#allocation2 + $0x4a8] ss:$16 sps:$4 sm:$0xff]  }
  0x76   :  { %1381 = vmatpush1.bf16.msra.mxu0 %v3497_v35  ;;  %v3586_v35 = vld [vmem:[#allocation2 + $0x488] ss:$16 sps:$4 sm:$0xff]  }
  0x77   :  { %1459 = vmatpush1.bf16.msra.mxu1 %v3494_v34  ;;  %1382 = vmatprep.subr.bf16.mxu0 %v3505_v37  ;;  %v3591_v34 = vld [vmem:[#allocation2 + $0x24c] ss:$16 sps:$4 sm:$0xff]  }
  0x78   :  { %1460 = vmatprep.subr.bf16.mxu1 %v3502_v36  ;;  %v3594_v36 = vld [vmem:[#allocation2 + $0x46c] ss:$16 sps:$4 sm:$0xff]  }
  0x79   :  { %v3597_v37 = vld [vmem:[#allocation2 + $0x22c] ss:$16 sps:$4 sm:$0xff]  }
  0x7a   :  { %1383 = vmatpush1.bf16.msra.mxu0 %v3503_v39  ;;  %v3595_v39 = vld [vmem:[#allocation2 + $0x228] ss:$16 sps:$4 sm:$0xff]  }
  0x7b   :  { %1461 = vmatpush1.bf16.msra.mxu1 %v3500_v38  ;;  %1384 = vmatprep.subr.bf16.mxu0 %v3511_v41  ;;  %v3592_v38 = vld [vmem:[#allocation2 + $0x468] ss:$16 sps:$4 sm:$0xff]  }
  0x7c   :  { %1462 = vmatprep.subr.bf16.mxu1 %v3508_v40  ;;  %v3603_v40 = vld [vmem:[#allocation2 + $0x20c] ss:$16 sps:$4 sm:$0xff]   ;;  %v3598_v41 = vld [vmem:[#allocation2 + $0x448] ss:$16 sps:$4 sm:$0xff]  }
  0x7e   :  { %1385 = vmatpush2.bf16.msra.mxu0 %v3509_v43  ;;  %v3606_v43 = vld [vmem:[#allocation2 + $0x42c] ss:$16 sps:$4 sm:$0xff]  }
  0x7f   :  { %1463 = vmatpush1.bf16.msra.mxu1 %v3506_v42  ;;  %1386 = vmatprep.subr.bf16.mxu0 %v3517_v45  ;;  %v3601_v42 = vld [vmem:[#allocation2 + $0x208] ss:$16 sps:$4 sm:$0xff]  }
  0x80   :  { %1464 = vmatprep.subr.bf16.mxu1 %v3514_v44  ;;  %v3609_v44 = vld [vmem:[#allocation2 + $0x3ec] ss:$16 sps:$4 sm:$0xff]   ;;  %v3604_v45 = vld [vmem:[#allocation2 + $0x428] ss:$16 sps:$4 sm:$0xff]  }
  0x82   :  { %1387 = vmatpush2.bf16.msra.mxu0 %v3515_v47  ;;  %v3612_v47 = vld [vmem:[#allocation2 + $0x40c] ss:$16 sps:$4 sm:$0xff]  }
  0x83   :  { %1465 = vmatpush1.bf16.msra.mxu1 %v3512_v46  ;;  %1388 = vmatprep.subr.bf16.mxu0 %v3523_v49  ;;  %v3607_v46 = vld [vmem:[#allocation2 + $0x3e8] ss:$16 sps:$4 sm:$0xff]  }
  0x84   :  { %1466 = vmatprep.subr.bf16.mxu1 %v3520_v48  ;;  %v3615_v48 = vld [vmem:[#allocation2 + $0x3cc] ss:$16 sps:$4 sm:$0xff]   ;;  %v3610_v49 = vld [vmem:[#allocation2 + $0x408] ss:$16 sps:$4 sm:$0xff]  }
  0x86   :  { %1389 = vmatpush2.bf16.msra.mxu0 %v3521_v52  ;;  %v3618_v52 = vld [vmem:[#allocation2 + $0x5ec] ss:$16 sps:$4 sm:$0xff]  }
  0x87   :  { %1467 = vmatpush2.bf16.msra.mxu1 %v3518_v50  ;;  %1390 = vmatprep.subr.bf16.mxu0 %v3529_v54  ;;  %v3613_v50 = vld [vmem:[#allocation2 + $0x3c8] ss:$16 sps:$4 sm:$0xff]  }
  0x88   :  { %1468 = vmatprep.subr.bf16.mxu1 %v3526_v53  ;;  %v3621_v53 = vld [vmem:[#allocation2 + $0x3ac] ss:$16 sps:$4 sm:$0xff]   ;;  %v3616_v54 = vld [vmem:[#allocation2 + $0x5e8] ss:$16 sps:$4 sm:$0xff]  }
  0x8a   :  { %1391 = vmatpush2.bf16.msra.mxu0 %v3527_v56  ;;  %v3624_v56 = vld [vmem:[#allocation2 + $0x5cc] ss:$16 sps:$4 sm:$0xff]  }
  0x8b   :  { %1469 = vmatpush2.bf16.msra.mxu1 %v3524_v55  ;;  %1392 = vmatprep.subr.bf16.mxu0 %v3535_v58  ;;  %v3619_v55 = vld [vmem:[#allocation2 + $0x3a8] ss:$16 sps:$4 sm:$0xff]  }
  0x8c   :  { %1470 = vmatprep.subr.bf16.mxu1 %v3532_v57  ;;  %v3627_v57 = vld [vmem:[#allocation2 + $0x38c] ss:$16 sps:$4 sm:$0xff]   ;;  %v3622_v58 = vld [vmem:[#allocation2 + $0x5c8] ss:$16 sps:$4 sm:$0xff]  }
  0x8e   :  { %1393 = vmatpush2.bf16.msra.mxu0 %v3533_v60  ;;  %v3630_v60 = vld [vmem:[#allocation2 + $0x5ac] ss:$16 sps:$4 sm:$0xff]  }
  0x8f   :  { %1471 = vmatpush2.bf16.msra.mxu1 %v3530_v59  ;;  %1394 = vmatprep.subr.bf16.mxu0 %v3541_v62  ;;  %v3625_v59 = vld [vmem:[#allocation2 + $0x388] ss:$16 sps:$4 sm:$0xff]  }
  0x90   :  { %1472 = vmatprep.subr.bf16.mxu1 %v3538_v61  ;;  %v3633_v61 = vld [vmem:[#allocation2 + $0x36c] ss:$16 sps:$4 sm:$0xff]   ;;  %v3628_v62 = vld [vmem:[#allocation2 + $0x5a8] ss:$16 sps:$4 sm:$0xff]  }
  0x92   :  { %1395 = vmatpush2.bf16.msra.mxu0 %v3539_v0  ;;  %v3636_v0 = vld [vmem:[#allocation2 + $0x58c] ss:$16 sps:$4 sm:$0xff]  }
  0x93   :  { %1473 = vmatpush2.bf16.msra.mxu1 %v3536_v63  ;;  %1396 = vmatprep.subr.bf16.mxu0 %v3547_v2  ;;  %v3631_v63 = vld [vmem:[#allocation2 + $0x368] ss:$16 sps:$4 sm:$0xff]  }
  0x94   :  { %1474 = vmatprep.subr.bf16.mxu1 %v3544_v1  ;;  %v3639_v1 = vld [vmem:[#allocation2 + $0x34c] ss:$16 sps:$4 sm:$0xff]   ;;  %v3634_v2 = vld [vmem:[#allocation2 + $0x588] ss:$16 sps:$4 sm:$0xff]  }
  0x96   :  { %1397 = vmatpush2.bf16.msra.mxu0 %v3545_v4  ;;  %v3642_v4 = vld [vmem:[#allocation2 + $0x56c] ss:$16 sps:$4 sm:$0xff]  }
  0x97   :  { %1475 = vmatpush2.bf16.msra.mxu1 %v3542_v3  ;;  %1398 = vmatprep.subr.bf16.mxu0 %v3553_v8  ;;  %v3637_v3 = vld [vmem:[#allocation2 + $0x348] ss:$16 sps:$4 sm:$0xff]  }
  0x98   :  { %1476 = vmatprep.subr.bf16.mxu1 %v3550_v5  ;;  %v3645_v5 = vld [vmem:[#allocation2 + $0x32c] ss:$16 sps:$4 sm:$0xff]   ;;  %v3640_v8 = vld [vmem:[#allocation2 + $0x568] ss:$16 sps:$4 sm:$0xff]  }
  0x9a   :  { %1399 = vmatpush2.bf16.msra.mxu0 %v3551_v10  ;;  %v3648_v10 = vld [vmem:[#allocation2 + $0x54c] ss:$16 sps:$4 sm:$0xff]  }
  0x9b   :  { %1477 = vmatpush2.bf16.msra.mxu1 %v3548_v9  ;;  %1491 = vmatprep.subr.bf16.mxu0 %v3561_v12  ;;  %v3643_v9 = vld [vmem:[#allocation2 + $0x328] ss:$16 sps:$4 sm:$0xff]  }
  0x9c   :  { %1478 = vmatprep.subr.bf16.mxu1 %v3558_v11  ;;  %v3651_v11 = vld [vmem:[#allocation2 + $0x30c] ss:$16 sps:$4 sm:$0xff]   ;;  %v3646_v12 = vld [vmem:[#allocation2 + $0x548] ss:$16 sps:$4 sm:$0xff]  }
  0x9d   :  { %1401 = vmatmul.mubr.bf16.vlgmr.msra.gmra.mxu0 %v4040_v14 }
  0x9e   :  { %1492 = vmatpush1.bf16.msra.mxu0 %v3559_v16  ;;  %1523 = vmatprep.mubr.bf16.mxu0 %v4012_v51  ;;  %v3588_v51 = vld [vmem:[#allocation2 + $0x48c] ss:$16 sps:$4 sm:$0xff]  }
  0x9f   :  { %1479 = vmatpush2.bf16.msra.mxu1 %v3556_v15  ;;  %1493 = vmatprep.subr.bf16.mxu0 %v3567_v18  ;;  %v3649_v15 = vld [vmem:[#allocation2 + $0x308] ss:$16 sps:$4 sm:$0xff]   ;;  %v3654_v16 = vld [vmem:[#allocation2 + $0x52c] ss:$16 sps:$4 sm:$0xff]  }
  0xa0   :  { %1480 = vmatprep.subr.bf16.mxu1 %v3564_v17  ;;  %v3657_v17 = vld [vmem:[#allocation2 + $0x60c] ss:$16 sps:$4 sm:$0xff]   ;;  %v3652_v18 = vld [vmem:[#allocation2 + $0x528] ss:$16 sps:$4 sm:$0xff]  }
  0xa2   :  { %1494 = vmatpush1.bf16.msra.mxu0 %v3565_v20  ;;  %v3660_v20 = vld [vmem:[#allocation2 + $0x50c] ss:$16 sps:$4 sm:$0xff]  }
  0xa3   :  { %1481 = vmatpush2.bf16.msra.mxu1 %v3562_v19  ;;  %1495 = vmatprep.subr.bf16.mxu0 %v3573_v22  ;;  %v3655_v19 = vld [vmem:[#allocation2 + $0x608] ss:$16 sps:$4 sm:$0xff]  }
  0xa4   :  { %1532 = vmatprep.subr.bf16.mxu1 %v3570_v21  ;;  %v3663_v21 = vld [vmem:[#allocation5 + $0xe4] ss:$16 sps:$4 sm:$0xff]   ;;  %v3658_v22 = vld [vmem:[#allocation2 + $0x508] ss:$16 sps:$4 sm:$0xff]  }
  0xa6   :  { %1483 = vmatmul.mubr.bf16.vlgmr.msra.gmra.mxu1 %v4016_v6  ;;  %1496 = vmatpush1.bf16.msra.mxu0 %v3571_v24  ;;  %v3589_v6 = vld [vmem:[#allocation2 + $0x248] ss:$16 sps:$4 sm:$0xff]   ;;  %v3666_v24 = vld [vmem:[#allocation5 + $0xc4] ss:$16 sps:$4 sm:$0xff]  }
  0xa7   :  { %1533 = vmatpush1.bf16.msra.mxu1 %v3568_v23  ;;  %1497 = vmatprep.subr.bf16.mxu0 %v3579_v26  ;;  %v3661_v23 = vld [vmem:[#allocation5 + $0xe0] ss:$16 sps:$4 sm:$0xff]   ;;  %v3885_v26 = vld [vmem:[%s4203_s0 + $0x18] ss:$0 sps:$4 sm:$0xff]  }
  0xa8   :  { %1534 = vmatprep.subr.bf16.mxu1 %v3576_v25  ;;  %1564 = vmatprep.mubr.bf16.mxu1 %v4035_v33  ;;  %v3600_v33 = vld [vmem:[#allocation2 + $0x44c] ss:$16 sps:$4 sm:$0xff]   ;;  %v3664_v25 = vld [vmem:[#allocation5 + $0xc0] ss:$16 sps:$4 sm:$0xff]  }
  0xaa   :  { %1498 = vmatpush1.bf16.msra.mxu0 %v3577_v28  ;;  %v3670_v28 = vld [vmem:[#allocation5 + $0x80] ss:$16 sps:$4 sm:$0xff]  }
  0xab   :  { %1535 = vmatpush1.bf16.msra.mxu1 %v3574_v27  ;;  %1499 = vmatprep.subr.bf16.mxu0 %v3585_v30  ;;  %v3667_v27 = vld [vmem:[#allocation5 + $0xa0] ss:$16 sps:$4 sm:$0xff]   ;;  %v3717_v30 = vld [vmem:[#allocation5 + $0x2e4] ss:$16 sps:$4 sm:$0xff]  }
  0xac   :  { %1536 = vmatprep.subr.bf16.mxu1 %v3582_v29  ;;  %v3715_v29 = vld [vmem:[#allocation5 + $0x2e0] ss:$16 sps:$4 sm:$0xff]  }
  0xae   :  { %1500 = vmatpush1.bf16.msra.mxu0 %v3583_v32  ;;  %v3721_v32 = vld [vmem:[#allocation5 + $0x2c0] ss:$16 sps:$4 sm:$0xff]  }
  0xaf   :  { %1537 = vmatpush1.bf16.msra.mxu1 %v3580_v31  ;;  %1501 = vmatprep.subr.bf16.mxu0 %v3591_v34  ;;  %v3675_v31 = vld [vmem:[#allocation5 + $0x64] ss:$16 sps:$4 sm:$0xff]  }
  0xb0   :  { %1538 = vmatprep.subr.bf16.mxu1 %v3588_v51  ;;  %v3723_v51 = vld [vmem:[#allocation5 + $0x2c4] ss:$16 sps:$4 sm:$0xff]  }
  0xb1   :  { %v3678_v34 = vld [vmem:[#allocation5 + $0x44] ss:$16 sps:$4 sm:$0xff]  }
  0xb2   :  { %1502 = vmatpush1.bf16.msra.mxu0 %v3589_v6  ;;  %v3727_v6 = vld [vmem:[#allocation5 + $0x2a0] ss:$16 sps:$4 sm:$0xff]  }
  0xb3   :  { %1539 = vmatpush1.bf16.msra.mxu1 %v3586_v35  ;;  %1503 = vmatprep.subr.bf16.mxu0 %v3597_v37  ;;  %v3676_v35 = vld [vmem:[#allocation5 + $0x40] ss:$16 sps:$4 sm:$0xff]   ;;  %v3681_v37 = vld [vmem:[#allocation5 + $0x24] ss:$16 sps:$4 sm:$0xff]  }
  0xb4   :  { %1540 = vmatprep.subr.bf16.mxu1 %v3594_v36  ;;  %v3729_v36 = vld [vmem:[#allocation5 + $0x2a4] ss:$16 sps:$4 sm:$0xff]  }
  0xb6   :  { %1504 = vmatpush1.bf16.msra.mxu0 %v3595_v39  ;;  %v3733_v39 = vld [vmem:[#allocation5 + $0x280] ss:$16 sps:$4 sm:$0xff]  }
  0xb7   :  { %1541 = vmatpush1.bf16.msra.mxu1 %v3592_v38  ;;  %1505 = vmatprep.subr.bf16.mxu0 %v3603_v40  ;;  %v3679_v38 = vld [vmem:[#allocation5 + $0x20] ss:$16 sps:$4 sm:$0xff]   ;;  %v3684_v40 = vld [vmem:[#allocation5 + $0x4] ss:$16 sps:$4 sm:$0xff]  }
  0xb8   :  { %1542 = vmatprep.subr.bf16.mxu1 %v3600_v33  ;;  %v3735_v33 = vld [vmem:[#allocation5 + $0x284] ss:$16 sps:$4 sm:$0xff]  }
  0xba   :  { %1506 = vmatpush1.bf16.msra.mxu0 %v3601_v42  ;;  %v3739_v42 = vld [vmem:[#allocation5 + $0x260] ss:$16 sps:$4 sm:$0xff]  }
  0xbb   :  { %1543 = vmatpush1.bf16.msra.mxu1 %v3598_v41  ;;  %1507 = vmatprep.subr.bf16.mxu0 %v3609_v44  ;;  %v3682_v41 = vld [vmem:[#allocation5] ss:$16 sps:$4 sm:$0xff]   ;;  %v3687_v44 = vld [vmem:[#allocation5 + $0x1e4] ss:$16 sps:$4 sm:$0xff]  }
  0xbc   :  { %1544 = vmatprep.subr.bf16.mxu1 %v3606_v43  ;;  %v3741_v43 = vld [vmem:[#allocation5 + $0x264] ss:$16 sps:$4 sm:$0xff]  }
  0xbe   :  { %1508 = vmatpush2.bf16.msra.mxu0 %v3607_v46  ;;  %v3745_v46 = vld [vmem:[#allocation5 + $0x240] ss:$16 sps:$4 sm:$0xff]  }
  0xbf   :  { %1545 = vmatpush1.bf16.msra.mxu1 %v3604_v45  ;;  %1509 = vmatprep.subr.bf16.mxu0 %v3615_v48  ;;  %v3685_v45 = vld [vmem:[#allocation5 + $0x1e0] ss:$16 sps:$4 sm:$0xff]   ;;  %v3690_v48 = vld [vmem:[#allocation5 + $0x1c4] ss:$16 sps:$4 sm:$0xff]  }
  0xc0   :  { %1546 = vmatprep.subr.bf16.mxu1 %v3612_v47  ;;  %v3747_v47 = vld [vmem:[#allocation5 + $0x244] ss:$16 sps:$4 sm:$0xff]  }
  0xc2   :  { %1510 = vmatpush2.bf16.msra.mxu0 %v3613_v50  ;;  %v3751_v50 = vld [vmem:[#allocation5 + $0x220] ss:$16 sps:$4 sm:$0xff]  }
  0xc3   :  { %1547 = vmatpush1.bf16.msra.mxu1 %v3610_v49  ;;  %1511 = vmatprep.subr.bf16.mxu0 %v3621_v53  ;;  %v3688_v49 = vld [vmem:[#allocation5 + $0x1c0] ss:$16 sps:$4 sm:$0xff]   ;;  %v3693_v53 = vld [vmem:[#allocation5 + $0x1a4] ss:$16 sps:$4 sm:$0xff]  }
  0xc4   :  { %1548 = vmatprep.subr.bf16.mxu1 %v3618_v52  ;;  %v3753_v52 = vld [vmem:[#allocation5 + $0x224] ss:$16 sps:$4 sm:$0xff]  }
  0xc6   :  { %1512 = vmatpush2.bf16.msra.mxu0 %v3619_v55  ;;  %v3757_v55 = vld [vmem:[#allocation5 + $0x200] ss:$16 sps:$4 sm:$0xff]  }
  0xc7   :  { %1549 = vmatpush2.bf16.msra.mxu1 %v3616_v54  ;;  %1513 = vmatprep.subr.bf16.mxu0 %v3627_v57  ;;  %v3691_v54 = vld [vmem:[#allocation5 + $0x1a0] ss:$16 sps:$4 sm:$0xff]   ;;  %v3696_v57 = vld [vmem:[#allocation5 + $0x184] ss:$16 sps:$4 sm:$0xff]  }
  0xc8   :  { %1550 = vmatprep.subr.bf16.mxu1 %v3624_v56  ;;  %v3759_v56 = vld [vmem:[#allocation5 + $0x204] ss:$16 sps:$4 sm:$0xff]  }
  0xca   :  { %1514 = vmatpush2.bf16.msra.mxu0 %v3625_v59  ;;  %v3763_v59 = vld [vmem:[#allocation5 + $0x3e0] ss:$16 sps:$4 sm:$0xff]  }
  0xcb   :  { %1551 = vmatpush2.bf16.msra.mxu1 %v3622_v58  ;;  %1515 = vmatprep.subr.bf16.mxu0 %v3633_v61  ;;  %v3694_v58 = vld [vmem:[#allocation5 + $0x180] ss:$16 sps:$4 sm:$0xff]   ;;  %v3699_v61 = vld [vmem:[#allocation5 + $0x164] ss:$16 sps:$4 sm:$0xff]  }
  0xcc   :  { %1552 = vmatprep.subr.bf16.mxu1 %v3630_v60  ;;  %v3765_v60 = vld [vmem:[#allocation5 + $0x3e4] ss:$16 sps:$4 sm:$0xff]  }
  0xce   :  { %1516 = vmatpush2.bf16.msra.mxu0 %v3631_v63  ;;  %v3769_v63 = vld [vmem:[#allocation5 + $0x3c0] ss:$16 sps:$4 sm:$0xff]  }
  0xcf   :  { %1553 = vmatpush2.bf16.msra.mxu1 %v3628_v62  ;;  %1517 = vmatprep.subr.bf16.mxu0 %v3639_v1  ;;  %v3697_v62 = vld [vmem:[#allocation5 + $0x160] ss:$16 sps:$4 sm:$0xff]   ;;  %v3702_v1 = vld [vmem:[#allocation5 + $0x144] ss:$16 sps:$4 sm:$0xff]  }
  0xd0   :  { %1554 = vmatprep.subr.bf16.mxu1 %v3636_v0  ;;  %v3771_v0 = vld [vmem:[#allocation5 + $0x3c4] ss:$16 sps:$4 sm:$0xff]  }
  0xd2   :  { %1518 = vmatpush2.bf16.msra.mxu0 %v3637_v3  ;;  %v3775_v3 = vld [vmem:[#allocation5 + $0x3a0] ss:$16 sps:$4 sm:$0xff]  }
  0xd3   :  { %1555 = vmatpush2.bf16.msra.mxu1 %v3634_v2  ;;  %1519 = vmatprep.subr.bf16.mxu0 %v3645_v5  ;;  %v3700_v2 = vld [vmem:[#allocation5 + $0x140] ss:$16 sps:$4 sm:$0xff]   ;;  %v3705_v5 = vld [vmem:[#allocation5 + $0x124] ss:$16 sps:$4 sm:$0xff]  }
  0xd4   :  { %1556 = vmatprep.subr.bf16.mxu1 %v3642_v4  ;;  %v3777_v4 = vld [vmem:[#allocation5 + $0x3a4] ss:$16 sps:$4 sm:$0xff]  }
  0xd6   :  { %1520 = vmatpush2.bf16.msra.mxu0 %v3643_v9  ;;  %v3781_v9 = vld [vmem:[#allocation5 + $0x380] ss:$16 sps:$4 sm:$0xff]  }
  0xd7   :  { %1557 = vmatpush2.bf16.msra.mxu1 %v3640_v8  ;;  %1521 = vmatprep.subr.bf16.mxu0 %v3651_v11  ;;  %v3703_v8 = vld [vmem:[#allocation5 + $0x120] ss:$16 sps:$4 sm:$0xff]   ;;  %v3708_v11 = vld [vmem:[#allocation5 + $0x104] ss:$16 sps:$4 sm:$0xff]  }
  0xd8   :  { %1558 = vmatprep.subr.bf16.mxu1 %v3648_v10  ;;  %v3783_v10 = vld [vmem:[#allocation5 + $0x384] ss:$16 sps:$4 sm:$0xff]  }
  0xda   :  { %1522 = vmatpush2.bf16.msra.mxu0 %v3649_v15 }
  0xdb   :  { %1559 = vmatpush2.bf16.msra.mxu1 %v3646_v12  ;;  %1587 = vmatprep.subr.bf16.mxu0 %v3657_v17  ;;  %v3789_v17 = vld [vmem:[#allocation5 + $0x364] ss:$16 sps:$4 sm:$0xff]  }
  0xdc   :  { %1560 = vmatprep.subr.bf16.mxu1 %v3654_v16  ;;  %v3706_v16 = vld [vmem:[#allocation5 + $0x100] ss:$16 sps:$4 sm:$0xff]  }
  0xdd   :  { %1524 = vmatmul.mubr.bf16.vlgmr.msra.gmra.mxu0 %v4018_v7  ;;  %v3669_v7 = vld [vmem:[#allocation5 + $0xa4] ss:$16 sps:$4 sm:$0xff]  }
  0xde   :  { %1588 = vmatpush1.bf16.msra.mxu0 %v3655_v19  ;;  %1605 = vmatprep.mubr.bf16.mxu0 %v3956_v13  ;;  %v3672_v13 = vld [vmem:[#allocation5 + $0x84] ss:$16 sps:$4 sm:$0xff]  }
  0xdf   :  { %1561 = vmatpush2.bf16.msra.mxu1 %v3652_v18  ;;  %2412 = vmatprep.subr.bf16.mxu0 %v3663_v21  ;;  %v3787_v21 = vld [vmem:[#allocation5 + $0x360] ss:$16 sps:$4 sm:$0xff]  }
  0xe0   :  { %1562 = vmatprep.subr.bf16.mxu1 %v3660_v20  ;;  %v3711_v20 = vld [vmem:[#allocation5 + $0xec] ss:$16 sps:$4 sm:$0xff]  }
  0xe3   :  { %1563 = vmatpush2.bf16.msra.mxu1 %v3658_v22 }
  0xe4   :  { %2453 = vmatprep.subr.bf16.mxu1 %v3717_v30 }
  0xe5   :  { %3148 = vmatmul.mubr.msk.bf16.vlgmr.msra.gmra.mxu0 %vm1282_vm0, %v3885_v26 }
  0xe6   :  { %1565 = vmatmul.mubr.bf16.vlgmr.msra.gmra.mxu1 %v4040_v14  ;;  %2413 = vmatpush1.bf16.msra.mxu0 %v3661_v23  ;;  %v3673_v14 = vld [vmem:[#allocation5 + $0x60] ss:$16 sps:$4 sm:$0xff]  }
  0xe7   :  { %2414 = vmatprep.subr.bf16.mxu0 %v3666_v24  ;;  %2454 = vmatpush1.bf16.msra.mxu1 %v3715_v29  ;;  %v3795_v24 = vld [vmem:[#allocation5 + $0x344] ss:$16 sps:$4 sm:$0xff]   ;;  %v3799_v29 = vld [vmem:[#allocation5 + $0x320] ss:$16 sps:$4 sm:$0xff]  }
  0xe8   :  { %2455 = vmatprep.subr.bf16.mxu1 %v3723_v51  ;;  %v3807_v51 = vld [vmem:[#allocation5 + $0x2ec] ss:$16 sps:$4 sm:$0xff]  }
  0xea   :  { %2415 = vmatpush1.bf16.msra.mxu0 %v3664_v25 }
  0xeb   :  { %2416 = vmatprep.subr.bf16.mxu0 %v3669_v7  ;;  %2456 = vmatpush1.bf16.msra.mxu1 %v3721_v32  ;;  %v3793_v7 = vld [vmem:[#allocation5 + $0x340] ss:$16 sps:$4 sm:$0xff]  }
  0xec   :  { %2457 = vmatprep.subr.bf16.mxu1 %v3729_v36  ;;  %v3802_v32 = vld [vmem:[#allocation5 + $0x300] ss:$16 sps:$4 sm:$0xff]  }
  0xed   :  { %v4059_v36 = vld [vmem:[%s4205_s2] sm:$0xf] }
  0xee   :  { %2417 = vmatpush1.bf16.msra.mxu0 %v3667_v27 }
  0xef   :  { %2418 = vmatprep.subr.bf16.mxu0 %v3672_v13  ;;  %2458 = vmatpush1.bf16.msra.mxu1 %v3727_v6  ;;  %v3801_v13 = vld [vmem:[#allocation5 + $0x324] ss:$16 sps:$4 sm:$0xff]  }
  0xf0   :  { %2459 = vmatprep.subr.bf16.mxu1 %v3735_v33 }
  0xf2   :  { %2419 = vmatpush1.bf16.msra.mxu0 %v3670_v28 }
  0xf3   :  { %2420 = vmatprep.subr.bf16.mxu0 %v3675_v31  ;;  %2460 = vmatpush1.bf16.msra.mxu1 %v3733_v39  ;;  %v3804_v31 = vld [vmem:[#allocation5 + $0x304] ss:$16 sps:$4 sm:$0xff]  }
  0xf4   :  { %2461 = vmatprep.subr.bf16.mxu1 %v3741_v43 }
  0xf6   :  { %2421 = vmatpush1.bf16.msra.mxu0 %v3673_v14 }
  0xf7   :  { %2422 = vmatprep.subr.bf16.mxu0 %v3678_v34  ;;  %2462 = vmatpush1.bf16.msra.mxu1 %v3739_v42  ;;  %v258_v34 = vlaneseq }
  0xf8   :  { %2463 = vmatprep.subr.bf16.mxu1 %v3747_v47 }
  0xfa   :  { %2423 = vmatpush1.bf16.msra.mxu0 %v3676_v35  ;;  %v4053_v35 = vshrl.u32 %v258_v34, 7 }
  0xfb   :  { %2424 = vmatprep.subr.bf16.mxu0 %v3681_v37  ;;  %2464 = vmatpush1.bf16.msra.mxu1 %v3745_v46 }
  0xfc   :  { %2465 = vmatprep.subr.bf16.mxu1 %v3753_v52  ;;  %v260_v6 = vsub.s32 0, %v4053_v35  ;;  %v264_v37 = vsub.s32 1, %v4053_v35 }
  0xfe   :  { %2425 = vmatpush1.bf16.msra.mxu0 %v3679_v38  ;;  %v261_v38 = vrot.slane %v4059_v36, %v260_v6  ;;  %v265_v39 = vrot.slane %v4059_v36, %v264_v37 }
  0xff   :  { %2426 = vmatprep.subr.bf16.mxu0 %v3684_v40  ;;  %2466 = vmatpush1.bf16.msra.mxu1 %v3751_v50 }
 0x100   :  { %2467 = vmatprep.subr.bf16.mxu1 %v3759_v56  ;;  %v3709_v56 = vld [vmem:[#allocation5 + $0xe8] ss:$16 sps:$4 sm:$0xff]  }
 0x102   :  { %2427 = vmatpush1.bf16.msra.mxu0 %v3682_v41 }
 0x103   :  { %2428 = vmatprep.subr.bf16.mxu0 %v3687_v44  ;;  %2468 = vmatpush1.bf16.msra.mxu1 %v3757_v55 }
 0x104   :  { %2469 = vmatprep.subr.bf16.mxu1 %v3765_v60 }
 0x106   :  { %2429 = vmatpush2.bf16.msra.mxu0 %v3685_v45 }
 0x107   :  { %2430 = vmatprep.subr.bf16.mxu0 %v3690_v48  ;;  %2470 = vmatpush2.bf16.msra.mxu1 %v3763_v59  ;;  %v3714_v59 = vld [vmem:[#allocation5 + $0xcc] ss:$16 sps:$4 sm:$0xff]  }
 0x108   :  { %2471 = vmatprep.subr.bf16.mxu1 %v3771_v0  ;;  %v3718_v0 = vld [vmem:[#allocation5 + $0xa8] ss:$16 sps:$4 sm:$0xff]  }
 0x10a   :  { %2431 = vmatpush2.bf16.msra.mxu0 %v3688_v49 }
 0x10b   :  { %2432 = vmatprep.subr.bf16.mxu0 %v3693_v53  ;;  %2472 = vmatpush2.bf16.msra.mxu1 %v3769_v63  ;;  %v3720_v63 = vld [vmem:[#allocation5 + $0xac] ss:$16 sps:$4 sm:$0xff]  }
 0x10c   :  { %2473 = vmatprep.subr.bf16.mxu1 %v3777_v4  ;;  %v3730_v4 = vld [vmem:[#allocation5 + $0x68] ss:$16 sps:$4 sm:$0xff]  }
 0x10e   :  { %2433 = vmatpush2.bf16.msra.mxu0 %v3691_v54 }
 0x10f   :  { %2434 = vmatprep.subr.bf16.mxu0 %v3696_v57  ;;  %2474 = vmatpush2.bf16.msra.mxu1 %v3775_v3  ;;  %v3732_v3 = vld [vmem:[#allocation5 + $0x6c] ss:$16 sps:$4 sm:$0xff]  }
 0x110   :  { %2475 = vmatprep.subr.bf16.mxu1 %v3783_v10  ;;  %v3742_v10 = vld [vmem:[#allocation5 + $0x28] ss:$16 sps:$4 sm:$0xff]  }
 0x112   :  { %2435 = vmatpush2.bf16.msra.mxu0 %v3694_v58 }
 0x113   :  { %2436 = vmatprep.subr.bf16.mxu0 %v3699_v61  ;;  %2476 = vmatpush2.bf16.msra.mxu1 %v3781_v9  ;;  %v3712_v61 = vld [vmem:[#allocation5 + $0xc8] ss:$16 sps:$4 sm:$0xff]   ;;  %v3744_v9 = vld [vmem:[#allocation5 + $0x2c] ss:$16 sps:$4 sm:$0xff]  }
 0x114   :  { %2477 = vmatprep.subr.bf16.mxu1 %v3789_v17  ;;  %v3762_v17 = vld [vmem:[#allocation5 + $0x1cc] ss:$16 sps:$4 sm:$0xff]  }
 0x116   :  { %2437 = vmatpush2.bf16.msra.mxu0 %v3697_v62 }
 0x117   :  { %2438 = vmatprep.subr.bf16.mxu0 %v3702_v1  ;;  %2478 = vmatpush2.bf16.msra.mxu1 %v3787_v21  ;;  %v3726_v1 = vld [vmem:[#allocation5 + $0x8c] ss:$16 sps:$4 sm:$0xff]  }
 0x118   :  { %2479 = vmatprep.subr.bf16.mxu1 %v3795_v24  ;;  %v3774_v21 = vld [vmem:[#allocation5 + $0x18c] ss:$16 sps:$4 sm:$0xff]   ;;  %v3778_v24 = vld [vmem:[#allocation5 + $0x168] ss:$16 sps:$4 sm:$0xff]  }
 0x11a   :  { %2439 = vmatpush2.bf16.msra.mxu0 %v3700_v2  ;;  %v3724_v2 = vld [vmem:[#allocation5 + $0x88] ss:$16 sps:$4 sm:$0xff]  }
 0x11b   :  { %2440 = vmatprep.subr.bf16.mxu0 %v3705_v5  ;;  %2480 = vmatpush2.bf16.msra.mxu1 %v3793_v7  ;;  %v3738_v5 = vld [vmem:[#allocation5 + $0x4c] ss:$16 sps:$4 sm:$0xff]   ;;  %v3784_v7 = vld [vmem:[#allocation5 + $0x148] ss:$16 sps:$4 sm:$0xff]  }
 0x11c   :  { %2481 = vmatprep.subr.bf16.mxu1 %v3801_v13  ;;  %v272_v13 = vsub.s32 3, %v4053_v35 }
 0x11d   :  { %v1320_v12 = vpop.f32.mrf.mxu0 }
 0x11e   :  { %v1361_v15 = vpop.f32.mrf.mxu1  ;;  %2441 = vmatpush2.bf16.msra.mxu0 %v3703_v8  ;;  %v1321_v33 = vadd.f32 %v1320_v12, %v261_v38  ;;  %v3736_v8 = vld [vmem:[#allocation5 + $0x48] ss:$16 sps:$4 sm:$0xff]  }
 0x11f   :  { %v1322_v18 = vpop.f32.mrf.mxu0  ;;  %2442 = vmatprep.subr.bf16.mxu0 %v3708_v11  ;;  %2482 = vmatpush2.bf16.msra.mxu1 %v3799_v29  ;;  %v3750_v11 = vld [vmem:[#allocation5 + $0xc] ss:$16 sps:$4 sm:$0xff]   ;;  %v3748_v12 = vld [vmem:[#allocation5 + $0x8] ss:$16 sps:$4 sm:$0xff]  }
 0x120   :  { %v1363_v19 = vpop.f32.mrf.mxu1  ;;  %2483 = vmatprep.subr.bf16.mxu1 %v3804_v31  ;;  %v1323_v40 = vadd.f32 %v1322_v18, %v265_v39  ;;  %v1362_v41 = vadd.f32 %v1361_v15, %v1321_v33  ;;  %v3756_v15 = vld [vmem:[#allocation5 + $0x1ec] ss:$16 sps:$4 sm:$0xff]   ;;  %v3760_v18 = vld [vmem:[#allocation5 + $0x1c8] ss:$16 sps:$4 sm:$0xff]  }
 0x121   :  { %v1324_v22 = vpop.f32.mrf.mxu0  ;;  %v3796_v38 = vld [vmem:[#allocation5 + $0x108] ss:$16 sps:$4 sm:$0xff]  }
 0x122   :  { %v1365_v23 = vpop.f32.mrf.mxu1  ;;  %2443 = vmatpush2.bf16.msra.mxu0 %v3706_v16  ;;  %v1364_v43 = vadd.f32 %v1363_v19, %v1323_v40  ;;  %v3754_v16 = vld [vmem:[#allocation5 + $0x1e8] ss:$16 sps:$4 sm:$0xff]   ;;  %v3768_v19 = vld [vmem:[#allocation5 + $0x1ac] ss:$16 sps:$4 sm:$0xff]  }
 0x123   :  { %v1325_v25 = vpop.f32.mrf.mxu0  ;;  %2494 = vmatprep.subr.bf16.mxu0 %v3711_v20  ;;  %2484 = vmatpush2.bf16.msra.mxu1 %v3802_v32  ;;  %v3766_v20 = vld [vmem:[#allocation5 + $0x1a8] ss:$16 sps:$4 sm:$0xff]   ;;  %v3780_v23 = vld [vmem:[#allocation5 + $0x16c] ss:$16 sps:$4 sm:$0xff]   ;;  %v273_v32 = vrot.slane %v4059_v36, %v272_v13 }
 0x124   :  { %v1366_v26 = vpop.f32.mrf.mxu1  ;;  %2535 = vmatprep.subr.bf16.mxu1 %v3807_v51  ;;  %v3772_v22 = vld [vmem:[#allocation5 + $0x188] ss:$16 sps:$4 sm:$0xff]   ;;  %v3786_v25 = vld [vmem:[#allocation5 + $0x14c] ss:$16 sps:$4 sm:$0xff]  }
 0x125   :  { %v268_v26 = vsub.s32 2, %v4053_v35 }
 0x126   :  { %v1443_v27 = vpop.f32.mrf.mxu1 }
 0x127   :  { %v269_v29 = vrot.slane %v4059_v36, %v268_v26 }
 0x128   :  { %v1445_v28 = vpop.f32.mrf.mxu1 }
 0x12a   :  { %v1447_v30 = vpop.f32.mrf.mxu1 }
 0x12b   :  { %v3790_v30 = vld [vmem:[#allocation5 + $0x128] ss:$16 sps:$4 sm:$0xff]  }
 0x12c   :  { %v1448_v14 = vpop.f32.mrf.mxu1 }
 0x12d   :  { %v3798_v14 = vld [vmem:[#allocation5 + $0x10c] ss:$16 sps:$4 sm:$0xff]  }
 0x15d   :  { %v1402_v42 = vpop.f32.mrf.mxu0 }
 0x15e   :  { %v1403_v44 = vadd.f32 %v1402_v42, %v1362_v41 }
 0x15f   :  { %v1404_v45 = vpop.f32.mrf.mxu0 }
 0x160   :  { %v1444_v46 = vadd.f32 %v1443_v27, %v1403_v44  ;;  %v1405_v47 = vadd.f32 %v1404_v45, %v1364_v43  ;;  %v3792_v27 = vld [vmem:[#allocation5 + $0x12c] ss:$16 sps:$4 sm:$0xff]  }
 0x161   :  { %v1406_v48 = vpop.f32.mrf.mxu0 }
 0x162   :  { %v1446_v49 = vadd.f32 %v1445_v28, %v1405_v47  ;;  %v1614_v50 = vmax.f32 %v1444_v46, 0.0 }
 0x163   :  { %v1407_v52 = vpop.f32.mrf.mxu0 }
 0x164   :  { %v1615_v53 = vmax.f32 %v1446_v49, 0.0  ;;  %v4070_v57 = vpack.c.bf16 %v1614_v50, %v1614_v50 }
 0x166   :  { %v4068_v54 = vpop.f32.mrf.mxu1  ;;  %v1619_v55 = vpack.c.bf16 %v1615_v53, %v1615_v53 }
 0x167   :  { %v1485_v34 = vadd.f32 %v4068_v54, %v269_v29  ;;  %v3843_v29 = vld [vmem:[#allocation5 + $0x36c] ss:$16 sps:$4 sm:$0xff]  }
 0x168   :  { %v4072_v58 = vpop.f32.mrf.mxu1  ;;  %2444 = vmatprep.mubr.bf16.mxu0 %v1619_v55 }
 0x169   :  { %2445 = vmatmul.mubr.bf16.vlgmr.msra.gmra.mxu0 %v4070_v57  ;;  %v1487_v33 = vadd.f32 %v4072_v58, %v273_v32  ;;  %v3805_v58 = vld [vmem:[#allocation5 + $0x2e8] ss:$16 sps:$4 sm:$0xff]   ;;  %v3849_v32 = vld [vmem:[#allocation5 + $0x32c] ss:$16 sps:$4 sm:$0xff]  }
 0x16a   :  { %v1488_v60 = vpop.f32.mrf.mxu1  ;;  %2495 = vmatpush1.bf16.msra.mxu0 %v3709_v56  ;;  %2526 = vmatprep.mubr.bf16.mxu0 %v1619_v55 }
 0x16b   :  { %2496 = vmatprep.subr.bf16.mxu0 %v3714_v59  ;;  %v3810_v60 = vld [vmem:[#allocation5 + $0x2cc] ss:$16 sps:$4 sm:$0xff]  }
 0x16c   :  { %v1489_v62 = vpop.f32.mrf.mxu1 }
 0x16d   :  { %v3854_v62 = vld [vmem:[%s4208_s5 + $0x38] sm:$0xff]  }
 0x16e   :  { %2497 = vmatpush1.bf16.msra.mxu0 %v3712_v61  ;;  %v3853_v61 = vld [vmem:[%s4208_s5 + $0x78] sm:$0xff]  }
 0x16f   :  { %2498 = vmatprep.subr.bf16.mxu0 %v3720_v63  ;;  %v3808_v63 = vld [vmem:[#allocation5 + $0x2c8] ss:$16 sps:$4 sm:$0xff]  }
 0x172   :  { %2499 = vmatpush1.bf16.msra.mxu0 %v3718_v0  ;;  %v3813_v0 = vld [vmem:[#allocation5 + $0x2ac] ss:$16 sps:$4 sm:$0xff]  }
 0x173   :  { %2500 = vmatprep.subr.bf16.mxu0 %v3726_v1  ;;  %v3856_v1 = vld [vmem:[%s4208_s5 + $0x30] sm:$0xff]  }
 0x176   :  { %2501 = vmatpush1.bf16.msra.mxu0 %v3724_v2  ;;  %v3857_v2 = vld [vmem:[%s4208_s5 + $0x68] sm:$0xff]  }
 0x177   :  { %2502 = vmatprep.subr.bf16.mxu0 %v3732_v3  ;;  %v3811_v3 = vld [vmem:[#allocation5 + $0x2a8] ss:$16 sps:$4 sm:$0xff]  }
 0x17a   :  { %2503 = vmatpush1.bf16.msra.mxu0 %v3730_v4  ;;  %v3816_v4 = vld [vmem:[#allocation5 + $0x28c] ss:$16 sps:$4 sm:$0xff]  }
 0x17b   :  { %2504 = vmatprep.subr.bf16.mxu0 %v3738_v5  ;;  %v3858_v5 = vld [vmem:[%s4208_s5 + $0x28] sm:$0xff]  }
 0x17e   :  { %2505 = vmatpush1.bf16.msra.mxu0 %v3736_v8  ;;  %v3859_v8 = vld [vmem:[%s4208_s5 + $0x60] sm:$0xff]  }
 0x17f   :  { %2506 = vmatprep.subr.bf16.mxu0 %v3744_v9  ;;  %v3814_v9 = vld [vmem:[#allocation5 + $0x288] ss:$16 sps:$4 sm:$0xff]  }
 0x182   :  { %2507 = vmatpush1.bf16.msra.mxu0 %v3742_v10  ;;  %v3819_v10 = vld [vmem:[#allocation5 + $0x26c] ss:$16 sps:$4 sm:$0xff]  }
 0x183   :  { %2508 = vmatprep.subr.bf16.mxu0 %v3750_v11  ;;  %v3860_v11 = vld [vmem:[%s4208_s5 + $0x20] sm:$0xff]  }
 0x186   :  { %2509 = vmatpush1.bf16.msra.mxu0 %v3748_v12  ;;  %v3817_v12 = vld [vmem:[#allocation5 + $0x268] ss:$16 sps:$4 sm:$0xff]  }
 0x187   :  { %2510 = vmatprep.subr.bf16.mxu0 %v3756_v15  ;;  %v3822_v15 = vld [vmem:[#allocation5 + $0x24c] ss:$16 sps:$4 sm:$0xff]  }
 0x18a   :  { %2511 = vmatpush2.bf16.msra.mxu0 %v3754_v16  ;;  %v3820_v16 = vld [vmem:[#allocation5 + $0x248] ss:$16 sps:$4 sm:$0xff]  }
 0x18b   :  { %2512 = vmatprep.subr.bf16.mxu0 %v3762_v17  ;;  %v3825_v17 = vld [vmem:[#allocation5 + $0x22c] ss:$16 sps:$4 sm:$0xff]  }
 0x18e   :  { %2513 = vmatpush2.bf16.msra.mxu0 %v3760_v18  ;;  %v3823_v18 = vld [vmem:[#allocation5 + $0x228] ss:$16 sps:$4 sm:$0xff]  }
 0x18f   :  { %2514 = vmatprep.subr.bf16.mxu0 %v3768_v19  ;;  %v3828_v19 = vld [vmem:[#allocation5 + $0x20c] ss:$16 sps:$4 sm:$0xff]  }
 0x192   :  { %2515 = vmatpush2.bf16.msra.mxu0 %v3766_v20  ;;  %v3826_v20 = vld [vmem:[#allocation5 + $0x208] ss:$16 sps:$4 sm:$0xff]  }
 0x193   :  { %2516 = vmatprep.subr.bf16.mxu0 %v3774_v21  ;;  %v3831_v21 = vld [vmem:[#allocation5 + $0x3ec] ss:$16 sps:$4 sm:$0xff]  }
 0x196   :  { %2517 = vmatpush2.bf16.msra.mxu0 %v3772_v22  ;;  %v3829_v22 = vld [vmem:[#allocation5 + $0x3e8] ss:$16 sps:$4 sm:$0xff]  }
 0x197   :  { %2518 = vmatprep.subr.bf16.mxu0 %v3780_v23  ;;  %v3834_v23 = vld [vmem:[#allocation5 + $0x3cc] ss:$16 sps:$4 sm:$0xff]  }
 0x19a   :  { %2519 = vmatpush2.bf16.msra.mxu0 %v3778_v24  ;;  %v3832_v24 = vld [vmem:[#allocation5 + $0x3c8] ss:$16 sps:$4 sm:$0xff]  }
 0x19b   :  { %2520 = vmatprep.subr.bf16.mxu0 %v3786_v25  ;;  %v3837_v25 = vld [vmem:[#allocation5 + $0x3ac] ss:$16 sps:$4 sm:$0xff]  }
 0x19d   :  { %v1525_v28 = vpop.f32.mrf.mxu0 }
 0x19e   :  { %2521 = vmatpush2.bf16.msra.mxu0 %v3784_v7  ;;  %v1526_v40 = vadd.f32 %v1525_v28, %v1485_v34  ;;  %v3835_v7 = vld [vmem:[#allocation5 + $0x3a8] ss:$16 sps:$4 sm:$0xff]   ;;  %v3852_v34 = vld [vmem:[#allocation5 + $0x30c] ss:$16 sps:$4 sm:$0xff]  }
 0x19f   :  { %v1527_v31 = vpop.f32.mrf.mxu0  ;;  %2522 = vmatprep.subr.bf16.mxu0 %v3792_v27  ;;  %v3840_v27 = vld [vmem:[#allocation5 + $0x38c] ss:$16 sps:$4 sm:$0xff]   ;;  %v3838_v28 = vld [vmem:[#allocation5 + $0x388] ss:$16 sps:$4 sm:$0xff]  }
 0x1a0   :  { %v1528_v43 = vadd.f32 %v1527_v31, %v1487_v33  ;;  %v3846_v31 = vld [vmem:[#allocation5 + $0x34c] ss:$16 sps:$4 sm:$0xff]  }
 0x1a1   :  { %v1529_v51 = vpop.f32.mrf.mxu0  ;;  %v3862_v33 = vld [vmem:[%s4208_s5 + $0x18] sm:$0xff]  }
 0x1a2   :  { %2523 = vmatpush2.bf16.msra.mxu0 %v3790_v30  ;;  %v3841_v30 = vld [vmem:[#allocation5 + $0x368] ss:$16 sps:$4 sm:$0xff]  }
 0x1a3   :  { %v1530_v39 = vpop.f32.mrf.mxu0  ;;  %2524 = vmatprep.subr.bf16.mxu0 %v3798_v14  ;;  %v3844_v14 = vld [vmem:[#allocation5 + $0x348] ss:$16 sps:$4 sm:$0xff]  }
 0x1a4   :  { %v3847_v51 = vld [vmem:[#allocation5 + $0x328] ss:$16 sps:$4 sm:$0xff]  }
 0x1a5   :  { %v1607_v42 = vpop.f32.mrf.mxu0  ;;  %v3861_v39 = vld [vmem:[%s4208_s5 + $0x58] sm:$0xff]  }
 0x1a6   :  { %v1566_v41 = vpop.f32.mrf.mxu1  ;;  %2525 = vmatpush2.bf16.msra.mxu0 %v3796_v38  ;;  %v3850_v38 = vld [vmem:[#allocation5 + $0x308] ss:$16 sps:$4 sm:$0xff]  }
 0x1a7   :  { %v1567_v44 = vadd.f32 %v1566_v41, %v1526_v40  ;;  %v1609_v46 = vpop.f32.mrf.mxu0  ;;  %3310 = vmatprep.subr.bf16.mxu0 %v3853_v61  ;;  %v3863_v40 = vld [vmem:[%s4208_s5 + $0x50] sm:$0xff]  }
 0x1a8   :  { %v1568_v45 = vpop.f32.mrf.mxu1  ;;  %v3864_v41 = vld [vmem:[%s4208_s5 + $0x10] sm:$0xff]  }
 0x1a9   :  { %v1608_v47 = vadd.f32 %v1607_v42, %v1567_v44  ;;  %v1569_v48 = vadd.f32 %v1568_v45, %v1528_v43  ;;  %2527 = vmatmul.mubr.bf16.vlgmr.msra.gmra.mxu0 %v4070_v57  ;;  %v1611_v49 = vpop.f32.mrf.mxu0  ;;  %v3855_v57 = vld [vmem:[%s4208_s5 + $0x70] sm:$0xff]   ;;  %v3865_v42 = vld [vmem:[%s4208_s5 + $0x48] sm:$0xff]   ;;  %v3867_v44 = vld [vmem:[%s4208_s5 + $0x40] sm:$0xff]  }
 0x1aa   :  { %v1570_v36 = vpop.f32.mrf.mxu1  ;;  %3311 = vmatpush3.bf16.msra.mxu0 %v3854_v62  ;;  %v3866_v43 = vld [vmem:[%s4208_s5 + $0x8] sm:$0xff]   ;;  %v3868_v45 = vld [vmem:[%s4208_s5] sm:$0xff]  }
 0x1ab   :  { %v1610_v50 = vadd.f32 %v1609_v46, %v1569_v48  ;;  %v1616_v52 = vmax.f32 %v1608_v47, 0.0  ;;  %v1612_v54 = vpop.f32.mrf.mxu0  ;;  %3312 = vmatprep.subr.bf16.mxu0 %v3855_v57  ;;  %v3869_v46 = vld [vmem:[%s4208_s5 + $0xf8] sm:$0xff]   ;;  %v3871_v48 = vld [vmem:[%s4208_s5 + $0xf0] sm:$0xff]   ;;  %v3873_v49 = vld [vmem:[%s4208_s5 + $0xe8] sm:$0xff]  }
 0x1ac   :  { %v1571_v53 = vpop.f32.mrf.mxu1  ;;  %v3870_v47 = vld [vmem:[%s4208_s5 + $0xb8] sm:$0xff]   ;;  %v3872_v36 = vld [vmem:[%s4208_s5 + $0xb0] sm:$0xff]   ;;  %v3881_v57 = vld [vmem:[%s4208_s5 + $0xc8] sm:$0xff]  }
 0x1ad   :  { %v1617_v55 = vmax.f32 %v1610_v50, 0.0  ;;  %v4086_v59 = vpack.c.bf16 %v1616_v52, %v1616_v52  ;;  %v3874_v50 = vld [vmem:[%s4208_s5 + $0xa8] sm:$0xff]   ;;  %v3875_v52 = vld [vmem:[%s4208_s5 + $0xe0] sm:$0xff]   ;;  %v3877_v54 = vld [vmem:[%s4208_s5 + $0xd8] sm:$0xff]  }
 0x1ae   :  { %3313 = vmatpush3.bf16.msra.mxu0 %v3856_v1  ;;  %v3876_v53 = vld [vmem:[%s4208_s5 + $0xa0] sm:$0xff]  }
 0x1af   :  { %v1621_v56 = vpack.c.bf16 %v1617_v55, %v1617_v55  ;;  %3314 = vmatprep.subr.bf16.mxu0 %v3857_v2  ;;  %v3878_v55 = vld [vmem:[%s4208_s5 + $0x98] sm:$0xff]   ;;  %v3884_v1 = vld [vmem:[%s4208_s5 + $0x80] sm:$0xff]  }
 0x1b0   :  { %v1750_v2 = vld [vmem:[%s4207_s4] sm:$0xf] }
 0x1b1   :  { %2485 = vmatprep.mubr.bf16.mxu1 %v1621_v56 }
 0x1b2   :  { %2486 = vmatmul.mubr.bf16.vlgmr.msra.gmra.mxu1 %v4086_v59  ;;  %3315 = vmatpush3.bf16.msra.mxu0 %v3858_v5  ;;  %v1755_v5 = vrot.slane %v1750_v2, %v260_v6  ;;  %v1763_v6 = vrot.slane %v1750_v2, %v268_v26 }
 0x1b3   :  { %2536 = vmatpush1.bf16.msra.mxu1 %v3805_v58  ;;  %2567 = vmatprep.mubr.bf16.mxu1 %v1621_v56  ;;  %v3879_v56 = vld [vmem:[%s4208_s5 + $0xd0] sm:$0xff]  }
 0x1b4   :  { %2537 = vmatprep.subr.bf16.mxu1 %v3810_v60  ;;  %3316 = vmatprep.subr.bf16.mxu0 %v3859_v8  ;;  %v3880_v58 = vld [vmem:[%s4208_s5 + $0x90] sm:$0xff]  }
 0x1b6   :  { %3317 = vmatpush3.bf16.msra.mxu0 %v3860_v11 }
 0x1b7   :  { %2538 = vmatpush1.bf16.msra.mxu1 %v3808_v63  ;;  %3318 = vmatprep.subr.bf16.mxu0 %v3861_v39  ;;  %v3882_v63 = vld [vmem:[%s4208_s5 + $0x88] sm:$0xff]  }
 0x1b8   :  { %2539 = vmatprep.subr.bf16.mxu1 %v3813_v0  ;;  %v3883_v0 = vld [vmem:[%s4208_s5 + $0xc0] sm:$0xff]  }
 0x1ba   :  { %3319 = vmatpush3.bf16.msra.mxu0 %v3862_v33 }
 0x1bb   :  { %2540 = vmatpush1.bf16.msra.mxu1 %v3811_v3  ;;  %3320 = vmatprep.subr.bf16.mxu0 %v3863_v40 }
 0x1bc   :  { %2541 = vmatprep.subr.bf16.mxu1 %v3816_v4 }
 0x1be   :  { %3321 = vmatpush3.bf16.msra.mxu0 %v3864_v41 }
 0x1bf   :  { %2542 = vmatpush1.bf16.msra.mxu1 %v3814_v9  ;;  %3322 = vmatprep.subr.bf16.mxu0 %v3865_v42  ;;  %v1759_v9 = vrot.slane %v1750_v2, %v264_v37  ;;  %v1767_v37 = vrot.slane %v1750_v2, %v272_v13  ;;  %v3277_v13 = vld [vmem:[%s4209_s6] ss:$0 sm:$0xff] }
 0x1c0   :  { %2543 = vmatprep.subr.bf16.mxu1 %v3819_v10 }
 0x1c2   :  { %3323 = vmatpush3.bf16.msra.mxu0 %v3866_v43 }
 0x1c3   :  { %2544 = vmatpush1.bf16.msra.mxu1 %v3817_v12  ;;  %3324 = vmatprep.subr.bf16.mxu0 %v3867_v44 }
 0x1c4   :  { %2545 = vmatprep.subr.bf16.mxu1 %v3822_v15 }
 0x1c6   :  { %3325 = vmatpush3.bf16.msra.mxu0 %v3868_v45 }
 0x1c7   :  { %2546 = vmatpush1.bf16.msra.mxu1 %v3820_v16 }
 0x1c8   :  { %2547 = vmatprep.subr.bf16.mxu1 %v3825_v17 }
 0x1cb   :  { %2548 = vmatpush1.bf16.msra.mxu1 %v3823_v18 }
 0x1cc   :  { %2549 = vmatprep.subr.bf16.mxu1 %v3828_v19 }
 0x1cf   :  { %2550 = vmatpush1.bf16.msra.mxu1 %v3826_v20 }
 0x1d0   :  { %2551 = vmatprep.subr.bf16.mxu1 %v3831_v21 }
 0x1d3   :  { %2552 = vmatpush2.bf16.msra.mxu1 %v3829_v22 }
 0x1d4   :  { %2553 = vmatprep.subr.bf16.mxu1 %v3834_v23 }
 0x1d7   :  { %2554 = vmatpush2.bf16.msra.mxu1 %v3832_v24 }
 0x1d8   :  { %2555 = vmatprep.subr.bf16.mxu1 %v3837_v25 }
 0x1db   :  { %2556 = vmatpush2.bf16.msra.mxu1 %v3835_v7 }
 0x1dc   :  { %2557 = vmatprep.subr.bf16.mxu1 %v3840_v27 }
 0x1df   :  { %2558 = vmatpush2.bf16.msra.mxu1 %v3838_v28 }
 0x1e0   :  { %2559 = vmatprep.subr.bf16.mxu1 %v3843_v29 }
 0x1e3   :  { %2560 = vmatpush2.bf16.msra.mxu1 %v3841_v30 }
 0x1e4   :  { %2561 = vmatprep.subr.bf16.mxu1 %v3846_v31 }
 0x1e7   :  { %2562 = vmatpush2.bf16.msra.mxu1 %v3844_v14 }
 0x1e8   :  { %2563 = vmatprep.subr.bf16.mxu1 %v3849_v32 }
 0x1eb   :  { %2564 = vmatpush2.bf16.msra.mxu1 %v3847_v51 }
 0x1ec   :  { %2565 = vmatprep.subr.bf16.mxu1 %v3852_v34 }
 0x1ef   :  { %2566 = vmatpush2.bf16.msra.mxu1 %v3850_v38 }
 0x1f0   :  { %3332 = vmatprep.subr.bf16.mxu1 %v3869_v46 }
 0x1f2   :  { %2568 = vmatmul.mubr.bf16.vlgmr.msra.gmra.mxu1 %v4086_v59 }
 0x1f3   :  { %3333 = vmatpush3.bf16.msra.mxu1 %v3870_v47 }
 0x1f4   :  { %3334 = vmatprep.subr.bf16.mxu1 %v3871_v48 }
 0x1f7   :  { %3335 = vmatpush3.bf16.msra.mxu1 %v3872_v36 }
 0x1f8   :  { %3336 = vmatprep.subr.bf16.mxu1 %v3873_v49 }
 0x1fb   :  { %3337 = vmatpush3.bf16.msra.mxu1 %v3874_v50 }
 0x1fc   :  { %3338 = vmatprep.subr.bf16.mxu1 %v3875_v52 }
 0x1ff   :  { %3339 = vmatpush3.bf16.msra.mxu1 %v3876_v53 }
 0x200   :  { %3340 = vmatprep.subr.bf16.mxu1 %v3877_v54 }
 0x203   :  { %3341 = vmatpush3.bf16.msra.mxu1 %v3878_v55 }
 0x204   :  { %3342 = vmatprep.subr.bf16.mxu1 %v3879_v56 }
 0x207   :  { %3343 = vmatpush3.bf16.msra.mxu1 %v3880_v58 }
 0x208   :  { %3344 = vmatprep.subr.bf16.mxu1 %v3881_v57 }
 0x20b   :  { %3345 = vmatpush3.bf16.msra.mxu1 %v3882_v63 }
 0x20c   :  { %3346 = vmatprep.subr.bf16.mxu1 %v3883_v0 }
 0x20f   :  { %3347 = vmatpush3.bf16.msra.mxu1 %v3884_v1 }
 0x229   :  { %v2446_v59 = vpop.f32.mrf.mxu0 }
 0x22a   :  { %v2447_v11 = vadd.f32 %v2446_v59, %v1755_v5 }
 0x22b   :  { %v2448_v60 = vpop.f32.mrf.mxu0 }
 0x22c   :  { %v2449_v15 = vadd.f32 %v2448_v60, %v1759_v9 }
 0x22d   :  { %v2450_v61 = vpop.f32.mrf.mxu0 }
 0x22f   :  { %v2451_v62 = vpop.f32.mrf.mxu0 }
 0x269   :  { %v2528_v3 = vpop.f32.mrf.mxu0 }
 0x26a   :  { %v2529_v25 = vadd.f32 %v2528_v3, %v1763_v6 }
 0x26b   :  { %v2530_v4 = vpop.f32.mrf.mxu0 }
 0x26c   :  { %v2531_v27 = vadd.f32 %v2530_v4, %v1767_v37 }
 0x26d   :  { %v2532_v8 = vpop.f32.mrf.mxu0 }
 0x26f   :  { %v2533_v10 = vpop.f32.mrf.mxu0 }
 0x272   :  { %v2487_v12 = vpop.f32.mrf.mxu1 }
 0x273   :  { %v2488_v16 = vadd.f32 %v2487_v12, %v2447_v11 }
 0x274   :  { %v2489_v17 = vpop.f32.mrf.mxu1 }
 0x275   :  { %v2490_v18 = vadd.f32 %v2489_v17, %v2449_v15  ;;  %v2576_v19 = vmax.f32 %v2488_v16, 0.0 }
 0x276   :  { %v2491_v20 = vpop.f32.mrf.mxu1 }
 0x277   :  { %v2577_v21 = vmax.f32 %v2490_v18, 0.0  ;;  %v2580_v24 = vpack.c.bf16 %v2576_v19, %v2576_v19 }
 0x278   :  { %v2492_v22 = vpop.f32.mrf.mxu1 }
 0x279   :  { %v2581_v23 = vpack.c.bf16 %v2577_v21, %v2577_v21 }
 0x27b   :  { %2879 = vmatprep.mubr.bf16.mxu0 %v2581_v23 }
 0x27c   :  { %2880 = vmatmul.mubr.bf16.vlgmr.msra.gmra.mxu0 %v2580_v24 }
 0x2b2   :  { %v2569_v7 = vpop.f32.mrf.mxu1 }
 0x2b3   :  { %v2570_v28 = vadd.f32 %v2569_v7, %v2529_v25 }
 0x2b4   :  { %v2571_v29 = vpop.f32.mrf.mxu1 }
 0x2b5   :  { %v2572_v30 = vadd.f32 %v2571_v29, %v2531_v27  ;;  %v2578_v31 = vmax.f32 %v2570_v28, 0.0 }
 0x2b6   :  { %v2573_v14 = vpop.f32.mrf.mxu1 }
 0x2b7   :  { %v2579_v32 = vmax.f32 %v2572_v30, 0.0  ;;  %v2582_v38 = vpack.c.bf16 %v2578_v31, %v2578_v31 }
 0x2b8   :  { %v2574_v51 = vpop.f32.mrf.mxu1 }
 0x2b9   :  { %v2583_v34 = vpack.c.bf16 %v2579_v32, %v2579_v32 }
 0x2bb   :  { %2919 = vmatprep.mubr.bf16.mxu1 %v2583_v34 }
 0x2bc   :  { %2920 = vmatmul.mubr.bf16.vlgmr.msra.gmra.mxu1 %v2582_v38 }
 0x33c   :  { %v3326_v39 = vpop.f32.mrf.mxu0 }
 0x33e   :  { %v3327_v33 = vpop.f32.mrf.mxu0 }
 0x33f   :  { %v3328_v35 = vadd.f32 %v3327_v33, %v3326_v39 }
 0x340   :  { %v3329_v26 = vpop.f32.mrf.mxu0 }
 0x341   :  { %v2882_v43 = vadd.f32 %v3328_v35, %v3277_v13 }
 0x342   :  { %v3330_v40 = vpop.f32.mrf.mxu0 }
 0x37c   :  { %v3348_v41 = vpop.f32.mrf.mxu1 }
 0x37e   :  { %v3349_v42 = vpop.f32.mrf.mxu1 }
 0x37f   :  { %v3350_v44 = vadd.f32 %v3349_v42, %v3348_v41 }
 0x380   :  { %v3351_v45 = vpop.f32.mrf.mxu1 }
 0x381   :  { %v2922_v46 = vadd.f32 %v3350_v44, %v2882_v43 }
 0x382   :  { %v3352_v47 = vpop.f32.mrf.mxu1 }
 0x383   :  { %2927 = vst [vmem:[#allocation7] sm:$0xff] %v2922_v46 }
 0x384   :  { %3937 = shalt.err (!%p3934_p0)
}
 0x385   :  { %2937 = dma.vmem_to_hbm [thread:$0]  %s2935_s11, 128, %s4210_s7, [#allocation4]  }
 0x386   :  { %3950 = dma.done.wait [#allocation4], 128  }
 0x387   :  { %3951 = vsyncadd [#allocation4], 4294967168 }
 0x388   :  { %2941 = vsyncpa [#allocation3], 1 }
 0x389   :  { %2942 = vsyncpa [#allocation6], 1 }
 0x38a   :  { %2943 = vsyncpa [#allocation4], 1 }

</bundles_post_ra>
